<compile_context>
chip_gen: v7x
topology: tpu7x:2x2x1
jax: 0.10.0
libtpu: 0.0.40
codegen_flags: <defaults>
</compile_context>

<pallas_src>
import numpy as np
import jax
import jax.numpy as jnp
from jax import lax
from jax.experimental import pallas as pl
from jax.experimental.pallas import tpu as pltpu


# ---------------------------------------------------------------------------
# Bilinear (align_corners=True) x2 upsample: separable padded operators
# ---------------------------------------------------------------------------
def _bilinear_matrix(n_in, n_out):
    """(n_out, n_in) linear-interp matrix with align_corners=True semantics (numpy)."""
    A = np.zeros((n_out, n_in), dtype=np.float32)
    if n_in == 1 or n_out == 1:
        A[:, 0] = 1.0
        return A
    for i in range(n_out):
        src = i * (n_in - 1) / (n_out - 1)
        lo = int(np.floor(src))
        hi = min(lo + 1, n_in - 1)
        frac = src - lo
        A[i, lo] += 1.0 - frac
        A[i, hi] += frac
    return A


def _separable_upsample_ops(H1, W1, H2, W2):
    """Padded separable operators ah_p (H2, H1) and aw_pT (W1, W2).

    F.pad (zero rows/cols around the upsampled block) is folded into the zero rows
    of ah_p / zero columns of aw_pT, so `ah_p @ x @ aw_pT` covers the full (H2, W2)
    interior.  Memory is O(H1*H2 + W1*W2) instead of (H*W)^2 for the kron form."""
    H1o, W1o = 2 * H1, 2 * W1
    pad_t = (H2 - H1o) // 2
    pad_l = (W2 - W1o) // 2
    ah_p = np.zeros((H2, H1), np.float32)
    ah_p[pad_t:pad_t + H1o, :] = _bilinear_matrix(H1, H1o)
    aw_pT = np.zeros((W1, W2), np.float32)
    aw_pT[:, pad_l:pad_l + W1o] = _bilinear_matrix(W1, W1o).T
    return jnp.asarray(ah_p), jnp.asarray(aw_pT)


# ---------------------------------------------------------------------------
# Fully fused up-block kernel (one grid step per batch element)
# ---------------------------------------------------------------------------
def up_fused_kernel(x1_ref, x2_ref, ahp_ref, awpt_ref, masks_ref,
                    w1_ref, w2_ref, sb1_ref, sb2_ref, o_ref,
                    xin, y1p, patches, tbuf):
    # x1_ref   : (1, C1*H1, W1)   low-res features, NCHW-flat rows, f32
    # x2_ref   : (1, C2, H2*W2)   skip connection, NCHW-flat, f32
    # ahp_ref  : (H2, H1)         padded H-interp operator, f32
    # awpt_ref : (W1, W2)         padded W-interp operator (transposed), f32
    # masks_ref: (2, H2*W2)       lane masks killing wrapped lanes of kx=0/kx=2 taps
    # w*_ref   : (Cout, 9*Cin)    conv taps, (ky,kx,cin)-major columns, bf16
    # sb*_ref  : (Cout, 2)        folded BN scale (col 0) / bias (col 1), f32
    # o_ref    : (1, Cout, H2*W2) lane-dense NCHW-flat output
    # xin      : VMEM (C2+C1, L) bf16, L=(H2+2)*W2+2 : flat zero-padded conv1 input
    # y1p      : VMEM (Cout,  L) bf16                : flat zero-padded conv1 act.
    # patches  : VMEM (9*(C2+C1), H2*W2) bf16        : im2col slab (reused by conv2)
    # tbuf     : VMEM (C1*H2, W1) f32                : H-interp intermediate
    H2, H1 = ahp_ref.shape
    W1, W2 = awpt_ref.shape
    C2, HW = x2_ref.shape[1], x2_ref.shape[2]
    C1 = x1_ref.shape[1] // H1
    Cin1 = C2 + C1
    Cout = o_ref.shape[1]
    L = xin.shape[1]
    lo = 1 + W2                       # flat offset of interior pixel (0, 0)

    # --- ring-only zeroing: [guard + top halo row] and [bottom halo row + guard] ---
    xin[:, 0:lo] = jnp.zeros((Cin1, lo), jnp.bfloat16)
    xin[:, L - lo:L] = jnp.zeros((Cin1, lo), jnp.bfloat16)
    y1p[:, 0:lo] = jnp.zeros((Cout, lo), jnp.bfloat16)
    y1p[:, L - lo:L] = jnp.zeros((Cout, lo), jnp.bfloat16)

    # --- torch.cat([x2, up(x1)], dim=1): skip connection -> channels [0, C2) ---
    xin[0:C2, lo:lo + HW] = x2_ref[0].astype(jnp.bfloat16)

    # --- separable bilinear x2 upsample (align_corners), F.pad folded in ---
    for c in range(C1):                                     # H-interp per channel
        tbuf[c * H2:(c + 1) * H2, :] = jnp.dot(
            ahp_ref[...], x1_ref[0, c * H1:(c + 1) * H1, :],
            preferred_element_type=jnp.float32)
    u = jnp.dot(tbuf[...], awpt_ref[...],                   # W-interp, one matmul
                preferred_element_type=jnp.float32)         # (C1*H2, W2)
    u = u.reshape(C1, H2, W2).astype(jnp.bfloat16)
    for i in range(H2):                                     # strided interior rows
        xin[C2:Cin1, lo + i * W2:lo + (i + 1) * W2] = u[:, i, :]

    mask_l = masks_ref[0:1, :]        # kills wrapped j==0 lane of kx=0 taps
    mask_r = masks_ref[1:2, :]        # kills wrapped j==W2-1 lane of kx=2 taps

    def conv_bn_relu(src, cin, w_ref, sb_ref):
        # im2col via contiguous lane-shifted flat slices; one MXU matmul with a
        # lane-dense (Cout, H2*W2) output (no final transpose needed).
        for ky in range(3):
            for kx in range(3):
                s0 = ky * W2 + kx
                tap = src[0:cin, s0:s0 + HW]
                if kx == 0:
                    tap = tap * mask_l
                elif kx == 2:
                    tap = tap * mask_r
                r0 = (ky * 3 + kx) * cin
                patches[r0:r0 + cin, :] = tap
        acc = jnp.dot(w_ref[...], patches[0:9 * cin, :],
                      preferred_element_type=jnp.float32)    # (Cout, HW) f32
        return jnp.maximum(acc * sb_ref[:, 0:1] + sb_ref[:, 1:2], 0.0)

    y1 = conv_bn_relu(xin, Cin1, w1_ref, sb1_ref)
    y1p[:, lo:lo + HW] = y1.astype(jnp.bfloat16)             # stays in VMEM
    y2 = conv_bn_relu(y1p, Cout, w2_ref, sb2_ref)
    # Lane-dense store: last dim H2*W2 (multiple of 128 for 16x16 -> unmasked vst;
    # non-multiples remain correct, just masked).
    o_ref[0] = y2


# ---------------------------------------------------------------------------
# Parameters (deterministic init), BN fold, and `up` forward
# ---------------------------------------------------------------------------
def _fold_bn(conv_bias, gamma, beta, mean, var, eps=1e-5):
    scale = gamma / jnp.sqrt(var + eps)
    bias = beta + scale * (conv_bias - mean)
    return scale, bias


def init_up_params(key, in_ch, out_ch):
    k1, k2 = jax.random.split(key)

    def conv_bn(k, cin, cout):
        w = 0.1 * jax.random.normal(k, (3, 3, cin, cout), jnp.float32)
        b = 0.01 * jnp.arange(cout, dtype=jnp.float32)
        gamma = 1.0 + 0.05 * jnp.arange(cout, dtype=jnp.float32)
        beta = 0.02 * jnp.arange(cout, dtype=jnp.float32)
        mean = 0.03 * jnp.arange(cout, dtype=jnp.float32)
        var = 1.0 + 0.10 * jnp.arange(cout, dtype=jnp.float32)
        return dict(w=w, b=b, gamma=gamma, beta=beta, mean=mean, var=var)

    return dict(c1=conv_bn(k1, in_ch, out_ch), c2=conv_bn(k2, out_ch, out_ch))


def up_forward(x1_nchw, x2_nchw, params):
    """Pallas implementation of up.forward (bilinear=True), fully fused."""
    x1 = x1_nchw.astype(jnp.float32)
    x2 = x2_nchw.astype(jnp.float32)
    N, C1, H1, W1 = x1.shape
    _, C2, H2, W2 = x2.shape
    assert H2 >= 2 * H1 and W2 >= 2 * W1, "negative F.pad (crop) not supported"

    c1, c2 = params['c1'], params['c2']
    Cin1 = C1 + C2
    Cout = c1['w'].shape[-1]
    HW = H2 * W2
    L = (H2 + 2) * W2 + 2            # flat padded length: vertical halo + 2 guards

    # NCHW-flat views: free reshapes of contiguous arrays (no HBM transpose pass).
    x1_k = x1.reshape(N, C1 * H1, W1)
    x2_k = x2.reshape(N, C2, HW)

    ahp, awpt = _separable_upsample_ops(H1, W1, H2, W2)

    jcol = np.arange(HW) % W2
    masks = jnp.asarray(np.stack([(jcol != 0), (jcol != W2 - 1)]).astype(np.float32),
                        dtype=jnp.bfloat16)                       # (2, HW)

    w1 = c1['w'].reshape(9 * Cin1, Cout).T.astype(jnp.bfloat16)   # (Cout, 9*Cin1)
    w2 = c2['w'].reshape(9 * Cout, Cout).T.astype(jnp.bfloat16)   # (Cout, 9*Cout)
    s1, b1 = _fold_bn(c1['b'], c1['gamma'], c1['beta'], c1['mean'], c1['var'])
    s2, b2 = _fold_bn(c2['b'], c2['gamma'], c2['beta'], c2['mean'], c2['var'])
    sb1 = jnp.stack([s1, b1], axis=1).astype(jnp.float32)         # (Cout, 2)
    sb2 = jnp.stack([s2, b2], axis=1).astype(jnp.float32)

    flops = N * (2 * C1 * H2 * H1 * W1 + 2 * C1 * H2 * W1 * W2
                 + 2 * HW * 9 * Cin1 * Cout + 2 * HW * 9 * Cout * Cout)
    bytes_accessed = int(x1.size * 4 + x2.size * 4 + ahp.size * 4 + awpt.size * 4
                         + masks.size * 2 + w1.size * 2 + w2.size * 2
                         + sb1.size * 4 + sb2.size * 4 + N * Cout * HW * 4)

    out_flat = pl.pallas_call(
        up_fused_kernel,
        out_shape=jax.ShapeDtypeStruct((N, Cout, HW), jnp.float32),
        grid=(N,),
        in_specs=[
            pl.BlockSpec((1, C1 * H1, W1), lambda n: (n, 0, 0)),
            pl.BlockSpec((1, C2, HW), lambda n: (n, 0, 0)),
            pl.BlockSpec((H2, H1), lambda n: (0, 0)),
            pl.BlockSpec((W1, W2), lambda n: (0, 0)),
            pl.BlockSpec((2, HW), lambda n: (0, 0)),
            pl.BlockSpec((Cout, 9 * Cin1), lambda n: (0, 0)),
            pl.BlockSpec((Cout, 9 * Cout), lambda n: (0, 0)),
            pl.BlockSpec((Cout, 2), lambda n: (0, 0)),
            pl.BlockSpec((Cout, 2), lambda n: (0, 0)),
        ],
        out_specs=pl.BlockSpec((1, Cout, HW), lambda n: (n, 0, 0)),
        scratch_shapes=[
            pltpu.VMEM((Cin1, L), jnp.bfloat16),           # padded conv1 input (flat)
            pltpu.VMEM((Cout, L), jnp.bfloat16),           # padded conv1 activation
            pltpu.VMEM((9 * Cin1, HW), jnp.bfloat16),      # im2col slab (shared)
            pltpu.VMEM((C1 * H2, W1), jnp.float32),        # H-interp intermediate
        ],
        compiler_params=pltpu.CompilerParams(
            dimension_semantics=("parallel",),
            vmem_limit_bytes=32 * 1024 * 1024),
        cost_estimate=pl.CostEstimate(
            flops=int(flops), transcendentals=0, bytes_accessed=bytes_accessed),
    )(x1_k, x2_k, ahp, awpt, masks, w1, w2, sb1, sb2)

    # TODO(synk): for large images add a spatial grid axis with a 1-row halo; currently
    # the whole per-image computation lives in VMEM (fine at these sizes).
    return out_flat.reshape(N, Cout, H2, W2)                      # NCHW directly


# ---------------------------------------------------------------------------
# Pure-JAX reference (same bf16-MXU / f32-accumulate policy, independent structure)
# ---------------------------------------------------------------------------
def ref_forward(x1_nchw, x2_nchw, params):
    x1 = jnp.transpose(x1_nchw, (0, 2, 3, 1)).astype(jnp.float32)
    x2 = jnp.transpose(x2_nchw, (0, 2, 3, 1)).astype(jnp.float32)
    N, H1, W1, C1 = x1.shape
    Ah = jnp.asarray(_bilinear_matrix(H1, 2 * H1))
    Aw = jnp.asarray(_bilinear_matrix(W1, 2 * W1))
    u = jnp.einsum('Hh,nhwc->nHwc', Ah, x1)
    u = jnp.einsum('Ww,nhwc->nhWc', Aw, u)
    dY = x2.shape[1] - u.shape[1]
    dX = x2.shape[2] - u.shape[2]
    u = jnp.pad(u, ((0, 0), (dY // 2, dY - dY // 2),
                    (dX // 2, dX - dX // 2), (0, 0)))
    x = jnp.concatenate([x2, u], axis=-1)

    def cbr(x, p):
        y = lax.conv_general_dilated(
            x.astype(jnp.bfloat16), p['w'].astype(jnp.bfloat16), (1, 1), 'SAME',
            dimension_numbers=('NHWC', 'HWIO', 'NHWC'),
            preferred_element_type=jnp.float32) + p['b']
        y = (y - p['mean']) / jnp.sqrt(p['var'] + 1e-5) * p['gamma'] + p['beta']
        return jnp.maximum(y, 0.0)

    x = cbr(x, params['c1'])
    x = cbr(x, params['c2'])
    return jnp.transpose(x, (0, 3, 1, 2))


if __name__ == "__main__":
    key = jax.random.PRNGKey(0)
    k1, k2, k3, kp = jax.random.split(key, 4)

    # up(in_ch=8, out_ch=4, bilinear=True):
    #   x1: low-res features (N, in_ch//2, H, W); x2: skip (N, in_ch//2, 2H, 2W)
    N, in_ch, out_ch = 2, 8, 4
    params = init_up_params(kp, in_ch, out_ch)

    # Case 1: standard UNet shapes (x2 exactly 2x x1) -> no F.pad needed
    x1 = jax.random.normal(k1, (N, in_ch // 2, 8, 8), jnp.float32)
    x2 = jax.random.normal(k2, (N, in_ch // 2, 16, 16), jnp.float32)
    out = jax.block_until_ready(up_forward(x1, x2, params))
    ref = jax.block_until_ready(ref_forward(x1, x2, params))
    assert out.shape == (N, out_ch, 16, 16), out.shape
    assert np.allclose(np.asarray(out), np.asarray(ref), atol=5e-3, rtol=5e-3)

    # Case 2: odd low-res size -> exercises the F.pad path (diffY = diffX = 2)
    x1b = jax.random.normal(k3, (N, in_ch // 2, 7, 7), jnp.float32)
    outb = jax.block_until_ready(up_forward(x1b, x2, params))
    refb = jax.block_until_ready(ref_forward(x1b, x2, params))
    assert outb.shape == (N, out_ch, 16, 16), outb.shape
    assert np.allclose(np.asarray(outb), np.asarray(refb), atol=5e-3, rtol=5e-3)

    print("KERNEL_OK")
</pallas_src>

<mosaic_0001>
module attributes {stable_mosaic.version = 11 : i64} {
  func.func @up_fused_kernel(%arg0: i32, %arg1: memref<1x32x8xf32, #tpu.memory_space<vmem>>, %arg2: memref<1x4x256xf32, #tpu.memory_space<vmem>>, %arg3: memref<16x8xf32, #tpu.memory_space<vmem>>, %arg4: memref<8x16xf32, #tpu.memory_space<vmem>>, %arg5: memref<2x256xbf16, #tpu.memory_space<vmem>>, %arg6: memref<4x72xbf16, #tpu.memory_space<vmem>>, %arg7: memref<4x36xbf16, #tpu.memory_space<vmem>>, %arg8: memref<4x2xf32, #tpu.memory_space<vmem>>, %arg9: memref<4x2xf32, #tpu.memory_space<vmem>>, %arg10: memref<1x4x256xf32, #tpu.memory_space<vmem>>, %arg11: memref<8x290xbf16, #tpu.memory_space<vmem>>, %arg12: memref<4x290xbf16, #tpu.memory_space<vmem>>, %arg13: memref<72x256xbf16, #tpu.memory_space<vmem>>, %arg14: memref<64x8xf32, #tpu.memory_space<vmem>>) attributes {dimension_semantics = [#tpu.dimension_semantics<parallel>], iteration_bounds = array<i64: 2>, scalar_prefetch = 0 : i64, scratch_operands = 4 : i64, tpu.core_type = #tpu.core_type<tc>, window_params = [{transform_indices = @transform_0, window_bounds = array<i64: 1, 32, 8>}, {transform_indices = @transform_1, window_bounds = array<i64: 1, 4, 256>}, {pipeline_mode = #tpu.pipeline_mode<synchronous>, transform_indices = @transform_2, window_bounds = array<i64: 16, 8>}, {pipeline_mode = #tpu.pipeline_mode<synchronous>, transform_indices = @transform_3, window_bounds = array<i64: 8, 16>}, {pipeline_mode = #tpu.pipeline_mode<synchronous>, transform_indices = @transform_4, window_bounds = array<i64: 2, 256>}, {pipeline_mode = #tpu.pipeline_mode<synchronous>, transform_indices = @transform_5, window_bounds = array<i64: 4, 72>}, {pipeline_mode = #tpu.pipeline_mode<synchronous>, transform_indices = @transform_6, window_bounds = array<i64: 4, 36>}, {pipeline_mode = #tpu.pipeline_mode<synchronous>, transform_indices = @transform_7, window_bounds = array<i64: 4, 2>}, {pipeline_mode = #tpu.pipeline_mode<synchronous>, transform_indices = @transform_8, window_bounds = array<i64: 4, 2>}, {transform_indices = @transform_9, window_bounds = array<i64: 1, 4, 256>}]} {
    %cst = arith.constant 0.000000e+00 : bf16
    %0 = vector.broadcast %cst : bf16 to vector<8x17xbf16>
    %c0 = arith.constant 0 : index
    %c0_0 = arith.constant 0 : index
    %1 = vector.load %arg11[%c0, %c0_0] : memref<8x290xbf16, #tpu.memory_space<vmem>>, vector<8x17xbf16>
    tpu.vector_store %arg11[%c0, %c0_0], %0 {strides = array<i32>} : memref<8x290xbf16, #tpu.memory_space<vmem>>, vector<8x17xbf16>,
    %cst_1 = arith.constant 0.000000e+00 : bf16
    %2 = vector.broadcast %cst_1 : bf16 to vector<8x17xbf16>
    %c0_2 = arith.constant 0 : index
    %c273 = arith.constant 273 : index
    %3 = vector.load %arg11[%c0_2, %c273] : memref<8x290xbf16, #tpu.memory_space<vmem>>, vector<8x17xbf16>
    tpu.vector_store %arg11[%c0_2, %c273], %2 {strides = array<i32>} : memref<8x290xbf16, #tpu.memory_space<vmem>>, vector<8x17xbf16>,
    %cst_3 = arith.constant 0.000000e+00 : bf16
    %4 = vector.broadcast %cst_3 : bf16 to vector<4x17xbf16>
    %c0_4 = arith.constant 0 : index
    %c0_5 = arith.constant 0 : index
    %5 = vector.load %arg12[%c0_4, %c0_5] : memref<4x290xbf16, #tpu.memory_space<vmem>>, vector<4x17xbf16>
    tpu.vector_store %arg12[%c0_4, %c0_5], %4 {strides = array<i32>} : memref<4x290xbf16, #tpu.memory_space<vmem>>, vector<4x17xbf16>,
    %cst_6 = arith.constant 0.000000e+00 : bf16
    %6 = vector.broadcast %cst_6 : bf16 to vector<4x17xbf16>
    %c0_7 = arith.constant 0 : index
    %c273_8 = arith.constant 273 : index
    %7 = vector.load %arg12[%c0_7, %c273_8] : memref<4x290xbf16, #tpu.memory_space<vmem>>, vector<4x17xbf16>
    tpu.vector_store %arg12[%c0_7, %c273_8], %6 {strides = array<i32>} : memref<4x290xbf16, #tpu.memory_space<vmem>>, vector<4x17xbf16>,
    %c0_9 = arith.constant 0 : index
    %c0_10 = arith.constant 0 : index
    %c0_11 = arith.constant 0 : index
    %8 = vector.load %arg2[%c0_9, %c0_10, %c0_11] : memref<1x4x256xf32, #tpu.memory_space<vmem>>, vector<1x4x256xf32>
    %9 = vector.shape_cast %8 : vector<1x4x256xf32> to vector<4x256xf32>
    %10 = arith.truncf %9 : vector<4x256xf32> to vector<4x256xbf16>
    %c0_12 = arith.constant 0 : index
    %c17 = arith.constant 17 : index
    %11 = vector.load %arg11[%c0_12, %c17] : memref<8x290xbf16, #tpu.memory_space<vmem>>, vector<4x256xbf16>
    tpu.vector_store %arg11[%c0_12, %c17], %10 {strides = array<i32>} : memref<8x290xbf16, #tpu.memory_space<vmem>>, vector<4x256xbf16>,
    %c0_13 = arith.constant 0 : index
    %c0_14 = arith.constant 0 : index
    %12 = vector.load %arg3[%c0_13, %c0_14] : memref<16x8xf32, #tpu.memory_space<vmem>>, vector<16x8xf32>
    %c0_15 = arith.constant 0 : index
    %c0_16 = arith.constant 0 : index
    %c0_17 = arith.constant 0 : index
    %13 = vector.load %arg1[%c0_15, %c0_16, %c0_17] : memref<1x32x8xf32, #tpu.memory_space<vmem>>, vector<1x8x8xf32>
    %14 = vector.shape_cast %13 : vector<1x8x8xf32> to vector<8x8xf32>
    %cst_18 = arith.constant dense<0.000000e+00> : vector<16x8xf32>
    %15 = tpu.matmul %12, %14, %cst_18 {dimension_numbers = #tpu.dot_dimension_numbers<[1], [0], [0], [1], [0, 0, 1, 1], [], []>} : vector<16x8xf32>, vector<8x8xf32>, vector<16x8xf32> -> vector<16x8xf32>
    %c0_19 = arith.constant 0 : index
    %c0_20 = arith.constant 0 : index
    %16 = vector.load %arg14[%c0_19, %c0_20] : memref<64x8xf32, #tpu.memory_space<vmem>>, vector<16x8xf32>
    tpu.vector_store %arg14[%c0_19, %c0_20], %15 {strides = array<i32>} : memref<64x8xf32, #tpu.memory_space<vmem>>, vector<16x8xf32>,
    %c0_21 = arith.constant 0 : index
    %c0_22 = arith.constant 0 : index
    %17 = vector.load %arg3[%c0_21, %c0_22] : memref<16x8xf32, #tpu.memory_space<vmem>>, vector<16x8xf32>
    %c0_23 = arith.constant 0 : index
    %c8 = arith.constant 8 : index
    %c0_24 = arith.constant 0 : index
    %18 = vector.load %arg1[%c0_23, %c8, %c0_24] : memref<1x32x8xf32, #tpu.memory_space<vmem>>, vector<1x8x8xf32>
    %19 = vector.shape_cast %18 : vector<1x8x8xf32> to vector<8x8xf32>
    %cst_25 = arith.constant dense<0.000000e+00> : vector<16x8xf32>
    %20 = tpu.matmul %17, %19, %cst_25 {dimension_numbers = #tpu.dot_dimension_numbers<[1], [0], [0], [1], [0, 0, 1, 1], [], []>} : vector<16x8xf32>, vector<8x8xf32>, vector<16x8xf32> -> vector<16x8xf32>
    %c16 = arith.constant 16 : index
    %c0_26 = arith.constant 0 : index
    %21 = vector.load %arg14[%c16, %c0_26] : memref<64x8xf32, #tpu.memory_space<vmem>>, vector<16x8xf32>
    tpu.vector_store %arg14[%c16, %c0_26], %20 {strides = array<i32>} : memref<64x8xf32, #tpu.memory_space<vmem>>, vector<16x8xf32>,
    %c0_27 = arith.constant 0 : index
    %c0_28 = arith.constant 0 : index
    %22 = vector.load %arg3[%c0_27, %c0_28] : memref<16x8xf32, #tpu.memory_space<vmem>>, vector<16x8xf32>
    %c0_29 = arith.constant 0 : index
    %c16_30 = arith.constant 16 : index
    %c0_31 = arith.constant 0 : index
    %23 = vector.load %arg1[%c0_29, %c16_30, %c0_31] : memref<1x32x8xf32, #tpu.memory_space<vmem>>, vector<1x8x8xf32>
    %24 = vector.shape_cast %23 : vector<1x8x8xf32> to vector<8x8xf32>
    %cst_32 = arith.constant dense<0.000000e+00> : vector<16x8xf32>
    %25 = tpu.matmul %22, %24, %cst_32 {dimension_numbers = #tpu.dot_dimension_numbers<[1], [0], [0], [1], [0, 0, 1, 1], [], []>} : vector<16x8xf32>, vector<8x8xf32>, vector<16x8xf32> -> vector<16x8xf32>
    %c32 = arith.constant 32 : index
    %c0_33 = arith.constant 0 : index
    %26 = vector.load %arg14[%c32, %c0_33] : memref<64x8xf32, #tpu.memory_space<vmem>>, vector<16x8xf32>
    tpu.vector_store %arg14[%c32, %c0_33], %25 {strides = array<i32>} : memref<64x8xf32, #tpu.memory_space<vmem>>, vector<16x8xf32>,
    %c0_34 = arith.constant 0 : index
    %c0_35 = arith.constant 0 : index
    %27 = vector.load %arg3[%c0_34, %c0_35] : memref<16x8xf32, #tpu.memory_space<vmem>>, vector<16x8xf32>
    %c0_36 = arith.constant 0 : index
    %c24 = arith.constant 24 : index
    %c0_37 = arith.constant 0 : index
    %28 = vector.load %arg1[%c0_36, %c24, %c0_37] : memref<1x32x8xf32, #tpu.memory_space<vmem>>, vector<1x8x8xf32>
    %29 = vector.shape_cast %28 : vector<1x8x8xf32> to vector<8x8xf32>
    %cst_38 = arith.constant dense<0.000000e+00> : vector<16x8xf32>
    %30 = tpu.matmul %27, %29, %cst_38 {dimension_numbers = #tpu.dot_dimension_numbers<[1], [0], [0], [1], [0, 0, 1, 1], [], []>} : vector<16x8xf32>, vector<8x8xf32>, vector<16x8xf32> -> vector<16x8xf32>
    %c48 = arith.constant 48 : index
    %c0_39 = arith.constant 0 : index
    %31 = vector.load %arg14[%c48, %c0_39] : memref<64x8xf32, #tpu.memory_space<vmem>>, vector<16x8xf32>
    tpu.vector_store %arg14[%c48, %c0_39], %30 {strides = array<i32>} : memref<64x8xf32, #tpu.memory_space<vmem>>, vector<16x8xf32>,
    %c0_40 = arith.constant 0 : index
    %c0_41 = arith.constant 0 : index
    %32 = vector.load %arg14[%c0_40, %c0_41] : memref<64x8xf32, #tpu.memory_space<vmem>>, vector<64x8xf32>
    %c0_42 = arith.constant 0 : index
    %c0_43 = arith.constant 0 : index
    %33 = vector.load %arg4[%c0_42, %c0_43] : memref<8x16xf32, #tpu.memory_space<vmem>>, vector<8x16xf32>
    %cst_44 = arith.constant dense<0.000000e+00> : vector<64x16xf32>
    %34 = tpu.matmul %32, %33, %cst_44 {dimension_numbers = #tpu.dot_dimension_numbers<[1], [0], [0], [1], [0, 0, 1, 1], [], []>} : vector<64x8xf32>, vector<8x16xf32>, vector<64x16xf32> -> vector<64x16xf32>
    %35 = vector.shape_cast %34 : vector<64x16xf32> to vector<4x16x16xf32>
    %36 = arith.truncf %35 : vector<4x16x16xf32> to vector<4x16x16xbf16>
    %37 = vector.extract_strided_slice %36 {offsets = [0, 0, 0], sizes = [4, 1, 16], strides = [1, 1, 1]} : vector<4x16x16xbf16> to vector<4x1x16xbf16>
    %38 = vector.shape_cast %37 : vector<4x1x16xbf16> to vector<4x16xbf16>
    %c4 = arith.constant 4 : index
    %c17_45 = arith.constant 17 : index
    %39 = vector.load %arg11[%c4, %c17_45] : memref<8x290xbf16, #tpu.memory_space<vmem>>, vector<4x16xbf16>
    tpu.vector_store %arg11[%c4, %c17_45], %38 {strides = array<i32>} : memref<8x290xbf16, #tpu.memory_space<vmem>>, vector<4x16xbf16>,
    %40 = vector.extract_strided_slice %36 {offsets = [0, 1, 0], sizes = [4, 1, 16], strides = [1, 1, 1]} : vector<4x16x16xbf16> to vector<4x1x16xbf16>
    %41 = vector.shape_cast %40 : vector<4x1x16xbf16> to vector<4x16xbf16>
    %c4_46 = arith.constant 4 : index
    %c33 = arith.constant 33 : index
    %42 = vector.load %arg11[%c4_46, %c33] : memref<8x290xbf16, #tpu.memory_space<vmem>>, vector<4x16xbf16>
    tpu.vector_store %arg11[%c4_46, %c33], %41 {strides = array<i32>} : memref<8x290xbf16, #tpu.memory_space<vmem>>, vector<4x16xbf16>,
    %43 = vector.extract_strided_slice %36 {offsets = [0, 2, 0], sizes = [4, 1, 16], strides = [1, 1, 1]} : vector<4x16x16xbf16> to vector<4x1x16xbf16>
    %44 = vector.shape_cast %43 : vector<4x1x16xbf16> to vector<4x16xbf16>
    %c4_47 = arith.constant 4 : index
    %c49 = arith.constant 49 : index
    %45 = vector.load %arg11[%c4_47, %c49] : memref<8x290xbf16, #tpu.memory_space<vmem>>, vector<4x16xbf16>
    tpu.vector_store %arg11[%c4_47, %c49], %44 {strides = array<i32>} : memref<8x290xbf16, #tpu.memory_space<vmem>>, vector<4x16xbf16>,
    %46 = vector.extract_strided_slice %36 {offsets = [0, 3, 0], sizes = [4, 1, 16], strides = [1, 1, 1]} : vector<4x16x16xbf16> to vector<4x1x16xbf16>
    %47 = vector.shape_cast %46 : vector<4x1x16xbf16> to vector<4x16xbf16>
    %c4_48 = arith.constant 4 : index
    %c65 = arith.constant 65 : index
    %48 = vector.load %arg11[%c4_48, %c65] : memref<8x290xbf16, #tpu.memory_space<vmem>>, vector<4x16xbf16>
    tpu.vector_store %arg11[%c4_48, %c65], %47 {strides = array<i32>} : memref<8x290xbf16, #tpu.memory_space<vmem>>, vector<4x16xbf16>,
    %49 = vector.extract_strided_slice %36 {offsets = [0, 4, 0], sizes = [4, 1, 16], strides = [1, 1, 1]} : vector<4x16x16xbf16> to vector<4x1x16xbf16>
    %50 = vector.shape_cast %49 : vector<4x1x16xbf16> to vector<4x16xbf16>
    %c4_49 = arith.constant 4 : index
    %c81 = arith.constant 81 : index
    %51 = vector.load %arg11[%c4_49, %c81] : memref<8x290xbf16, #tpu.memory_space<vmem>>, vector<4x16xbf16>
    tpu.vector_store %arg11[%c4_49, %c81], %50 {strides = array<i32>} : memref<8x290xbf16, #tpu.memory_space<vmem>>, vector<4x16xbf16>,
    %52 = vector.extract_strided_slice %36 {offsets = [0, 5, 0], sizes = [4, 1, 16], strides = [1, 1, 1]} : vector<4x16x16xbf16> to vector<4x1x16xbf16>
    %53 = vector.shape_cast %52 : vector<4x1x16xbf16> to vector<4x16xbf16>
    %c4_50 = arith.constant 4 : index
    %c97 = arith.constant 97 : index
    %54 = vector.load %arg11[%c4_50, %c97] : memref<8x290xbf16, #tpu.memory_space<vmem>>, vector<4x16xbf16>
    tpu.vector_store %arg11[%c4_50, %c97], %53 {strides = array<i32>} : memref<8x290xbf16, #tpu.memory_space<vmem>>, vector<4x16xbf16>,
    %55 = vector.extract_strided_slice %36 {offsets = [0, 6, 0], sizes = [4, 1, 16], strides = [1, 1, 1]} : vector<4x16x16xbf16> to vector<4x1x16xbf16>
    %56 = vector.shape_cast %55 : vector<4x1x16xbf16> to vector<4x16xbf16>
    %c4_51 = arith.constant 4 : index
    %c113 = arith.constant 113 : index
    %57 = vector.load %arg11[%c4_51, %c113] : memref<8x290xbf16, #tpu.memory_space<vmem>>, vector<4x16xbf16>
    tpu.vector_store %arg11[%c4_51, %c113], %56 {strides = array<i32>} : memref<8x290xbf16, #tpu.memory_space<vmem>>, vector<4x16xbf16>,
    %58 = vector.extract_strided_slice %36 {offsets = [0, 7, 0], sizes = [4, 1, 16], strides = [1, 1, 1]} : vector<4x16x16xbf16> to vector<4x1x16xbf16>
    %59 = vector.shape_cast %58 : vector<4x1x16xbf16> to vector<4x16xbf16>
    %c4_52 = arith.constant 4 : index
    %c129 = arith.constant 129 : index
    %60 = vector.load %arg11[%c4_52, %c129] : memref<8x290xbf16, #tpu.memory_space<vmem>>, vector<4x16xbf16>
    tpu.vector_store %arg11[%c4_52, %c129], %59 {strides = array<i32>} : memref<8x290xbf16, #tpu.memory_space<vmem>>, vector<4x16xbf16>,
    %61 = vector.extract_strided_slice %36 {offsets = [0, 8, 0], sizes = [4, 1, 16], strides = [1, 1, 1]} : vector<4x16x16xbf16> to vector<4x1x16xbf16>
    %62 = vector.shape_cast %61 : vector<4x1x16xbf16> to vector<4x16xbf16>
    %c4_53 = arith.constant 4 : index
    %c145 = arith.constant 145 : index
    %63 = vector.load %arg11[%c4_53, %c145] : memref<8x290xbf16, #tpu.memory_space<vmem>>, vector<4x16xbf16>
    tpu.vector_store %arg11[%c4_53, %c145], %62 {strides = array<i32>} : memref<8x290xbf16, #tpu.memory_space<vmem>>, vector<4x16xbf16>,
    %64 = vector.extract_strided_slice %36 {offsets = [0, 9, 0], sizes = [4, 1, 16], strides = [1, 1, 1]} : vector<4x16x16xbf16> to vector<4x1x16xbf16>
    %65 = vector.shape_cast %64 : vector<4x1x16xbf16> to vector<4x16xbf16>
    %c4_54 = arith.constant 4 : index
    %c161 = arith.constant 161 : index
    %66 = vector.load %arg11[%c4_54, %c161] : memref<8x290xbf16, #tpu.memory_space<vmem>>, vector<4x16xbf16>
    tpu.vector_store %arg11[%c4_54, %c161], %65 {strides = array<i32>} : memref<8x290xbf16, #tpu.memory_space<vmem>>, vector<4x16xbf16>,
    %67 = vector.extract_strided_slice %36 {offsets = [0, 10, 0], sizes = [4, 1, 16], strides = [1, 1, 1]} : vector<4x16x16xbf16> to vector<4x1x16xbf16>
    %68 = vector.shape_cast %67 : vector<4x1x16xbf16> to vector<4x16xbf16>
    %c4_55 = arith.constant 4 : index
    %c177 = arith.constant 177 : index
    %69 = vector.load %arg11[%c4_55, %c177] : memref<8x290xbf16, #tpu.memory_space<vmem>>, vector<4x16xbf16>
    tpu.vector_store %arg11[%c4_55, %c177], %68 {strides = array<i32>} : memref<8x290xbf16, #tpu.memory_space<vmem>>, vector<4x16xbf16>,
    %70 = vector.extract_strided_slice %36 {offsets = [0, 11, 0], sizes = [4, 1, 16], strides = [1, 1, 1]} : vector<4x16x16xbf16> to vector<4x1x16xbf16>
    %71 = vector.shape_cast %70 : vector<4x1x16xbf16> to vector<4x16xbf16>
    %c4_56 = arith.constant 4 : index
    %c193 = arith.constant 193 : index
    %72 = vector.load %arg11[%c4_56, %c193] : memref<8x290xbf16, #tpu.memory_space<vmem>>, vector<4x16xbf16>
    tpu.vector_store %arg11[%c4_56, %c193], %71 {strides = array<i32>} : memref<8x290xbf16, #tpu.memory_space<vmem>>, vector<4x16xbf16>,
    %73 = vector.extract_strided_slice %36 {offsets = [0, 12, 0], sizes = [4, 1, 16], strides = [1, 1, 1]} : vector<4x16x16xbf16> to vector<4x1x16xbf16>
    %74 = vector.shape_cast %73 : vector<4x1x16xbf16> to vector<4x16xbf16>
    %c4_57 = arith.constant 4 : index
    %c209 = arith.constant 209 : index
    %75 = vector.load %arg11[%c4_57, %c209] : memref<8x290xbf16, #tpu.memory_space<vmem>>, vector<4x16xbf16>
    tpu.vector_store %arg11[%c4_57, %c209], %74 {strides = array<i32>} : memref<8x290xbf16, #tpu.memory_space<vmem>>, vector<4x16xbf16>,
    %76 = vector.extract_strided_slice %36 {offsets = [0, 13, 0], sizes = [4, 1, 16], strides = [1, 1, 1]} : vector<4x16x16xbf16> to vector<4x1x16xbf16>
    %77 = vector.shape_cast %76 : vector<4x1x16xbf16> to vector<4x16xbf16>
    %c4_58 = arith.constant 4 : index
    %c225 = arith.constant 225 : index
    %78 = vector.load %arg11[%c4_58, %c225] : memref<8x290xbf16, #tpu.memory_space<vmem>>, vector<4x16xbf16>
    tpu.vector_store %arg11[%c4_58, %c225], %77 {strides = array<i32>} : memref<8x290xbf16, #tpu.memory_space<vmem>>, vector<4x16xbf16>,
    %79 = vector.extract_strided_slice %36 {offsets = [0, 14, 0], sizes = [4, 1, 16], strides = [1, 1, 1]} : vector<4x16x16xbf16> to vector<4x1x16xbf16>
    %80 = vector.shape_cast %79 : vector<4x1x16xbf16> to vector<4x16xbf16>
    %c4_59 = arith.constant 4 : index
    %c241 = arith.constant 241 : index
    %81 = vector.load %arg11[%c4_59, %c241] : memref<8x290xbf16, #tpu.memory_space<vmem>>, vector<4x16xbf16>
    tpu.vector_store %arg11[%c4_59, %c241], %80 {strides = array<i32>} : memref<8x290xbf16, #tpu.memory_space<vmem>>, vector<4x16xbf16>,
    %82 = vector.extract_strided_slice %36 {offsets = [0, 15, 0], sizes = [4, 1, 16], strides = [1, 1, 1]} : vector<4x16x16xbf16> to vector<4x1x16xbf16>
    %83 = vector.shape_cast %82 : vector<4x1x16xbf16> to vector<4x16xbf16>
    %c4_60 = arith.constant 4 : index
    %c257 = arith.constant 257 : index
    %84 = vector.load %arg11[%c4_60, %c257] : memref<8x290xbf16, #tpu.memory_space<vmem>>, vector<4x16xbf16>
    tpu.vector_store %arg11[%c4_60, %c257], %83 {strides = array<i32>} : memref<8x290xbf16, #tpu.memory_space<vmem>>, vector<4x16xbf16>,
    %c0_61 = arith.constant 0 : index
    %c0_62 = arith.constant 0 : index
    %85 = vector.load %arg5[%c0_61, %c0_62] : memref<2x256xbf16, #tpu.memory_space<vmem>>, vector<1x256xbf16>
    %c1 = arith.constant 1 : index
    %c0_63 = arith.constant 0 : index
    %86 = vector.load %arg5[%c1, %c0_63] : memref<2x256xbf16, #tpu.memory_space<vmem>>, vector<1x256xbf16>
    %c0_64 = arith.constant 0 : index
    %c0_65 = arith.constant 0 : index
    %87 = vector.load %arg11[%c0_64, %c0_65] : memref<8x290xbf16, #tpu.memory_space<vmem>>, vector<8x256xbf16>
    %88 = vector.broadcast %85 : vector<1x256xbf16> to vector<8x256xbf16>
    %89 = arith.mulf %87, %88 : vector<8x256xbf16>
    %c0_66 = arith.constant 0 : index
    %c0_67 = arith.constant 0 : index
    %90 = vector.load %arg13[%c0_66, %c0_67] : memref<72x256xbf16, #tpu.memory_space<vmem>>, vector<8x256xbf16>
    tpu.vector_store %arg13[%c0_66, %c0_67], %89 {strides = array<i32>} : memref<72x256xbf16, #tpu.memory_space<vmem>>, vector<8x256xbf16>,
    %c0_68 = arith.constant 0 : index
    %c1_69 = arith.constant 1 : index
    %91 = vector.load %arg11[%c0_68, %c1_69] : memref<8x290xbf16, #tpu.memory_space<vmem>>, vector<8x256xbf16>
    %c8_70 = arith.constant 8 : index
    %c0_71 = arith.constant 0 : index
    %92 = vector.load %arg13[%c8_70, %c0_71] : memref<72x256xbf16, #tpu.memory_space<vmem>>, vector<8x256xbf16>
    tpu.vector_store %arg13[%c8_70, %c0_71], %91 {strides = array<i32>} : memref<72x256xbf16, #tpu.memory_space<vmem>>, vector<8x256xbf16>,
    %c0_72 = arith.constant 0 : index
    %c2 = arith.constant 2 : index
    %93 = vector.load %arg11[%c0_72, %c2] : memref<8x290xbf16, #tpu.memory_space<vmem>>, vector<8x256xbf16>
    %94 = vector.broadcast %86 : vector<1x256xbf16> to vector<8x256xbf16>
    %95 = arith.mulf %93, %94 : vector<8x256xbf16>
    %c16_73 = arith.constant 16 : index
    %c0_74 = arith.constant 0 : index
    %96 = vector.load %arg13[%c16_73, %c0_74] : memref<72x256xbf16, #tpu.memory_space<vmem>>, vector<8x256xbf16>
    tpu.vector_store %arg13[%c16_73, %c0_74], %95 {strides = array<i32>} : memref<72x256xbf16, #tpu.memory_space<vmem>>, vector<8x256xbf16>,
    %c0_75 = arith.constant 0 : index
    %c16_76 = arith.constant 16 : index
    %97 = vector.load %arg11[%c0_75, %c16_76] : memref<8x290xbf16, #tpu.memory_space<vmem>>, vector<8x256xbf16>
    %98 = vector.broadcast %85 : vector<1x256xbf16> to vector<8x256xbf16>
    %99 = arith.mulf %97, %98 : vector<8x256xbf16>
    %c24_77 = arith.constant 24 : index
    %c0_78 = arith.constant 0 : index
    %100 = vector.load %arg13[%c24_77, %c0_78] : memref<72x256xbf16, #tpu.memory_space<vmem>>, vector<8x256xbf16>
    tpu.vector_store %arg13[%c24_77, %c0_78], %99 {strides = array<i32>} : memref<72x256xbf16, #tpu.memory_space<vmem>>, vector<8x256xbf16>,
    %c0_79 = arith.constant 0 : index
    %c17_80 = arith.constant 17 : index
    %101 = vector.load %arg11[%c0_79, %c17_80] : memref<8x290xbf16, #tpu.memory_space<vmem>>, vector<8x256xbf16>
    %c32_81 = arith.constant 32 : index
    %c0_82 = arith.constant 0 : index
    %102 = vector.load %arg13[%c32_81, %c0_82] : memref<72x256xbf16, #tpu.memory_space<vmem>>, vector<8x256xbf16>
    tpu.vector_store %arg13[%c32_81, %c0_82], %101 {strides = array<i32>} : memref<72x256xbf16, #tpu.memory_space<vmem>>, vector<8x256xbf16>,
    %c0_83 = arith.constant 0 : index
    %c18 = arith.constant 18 : index
    %103 = vector.load %arg11[%c0_83, %c18] : memref<8x290xbf16, #tpu.memory_space<vmem>>, vector<8x256xbf16>
    %104 = vector.broadcast %86 : vector<1x256xbf16> to vector<8x256xbf16>
    %105 = arith.mulf %103, %104 : vector<8x256xbf16>
    %c40 = arith.constant 40 : index
    %c0_84 = arith.constant 0 : index
    %106 = vector.load %arg13[%c40, %c0_84] : memref<72x256xbf16, #tpu.memory_space<vmem>>, vector<8x256xbf16>
    tpu.vector_store %arg13[%c40, %c0_84], %105 {strides = array<i32>} : memref<72x256xbf16, #tpu.memory_space<vmem>>, vector<8x256xbf16>,
    %c0_85 = arith.constant 0 : index
    %c32_86 = arith.constant 32 : index
    %107 = vector.load %arg11[%c0_85, %c32_86] : memref<8x290xbf16, #tpu.memory_space<vmem>>, vector<8x256xbf16>
    %108 = vector.broadcast %85 : vector<1x256xbf16> to vector<8x256xbf16>
    %109 = arith.mulf %107, %108 : vector<8x256xbf16>
    %c48_87 = arith.constant 48 : index
    %c0_88 = arith.constant 0 : index
    %110 = vector.load %arg13[%c48_87, %c0_88] : memref<72x256xbf16, #tpu.memory_space<vmem>>, vector<8x256xbf16>
    tpu.vector_store %arg13[%c48_87, %c0_88], %109 {strides = array<i32>} : memref<72x256xbf16, #tpu.memory_space<vmem>>, vector<8x256xbf16>,
    %c0_89 = arith.constant 0 : index
    %c33_90 = arith.constant 33 : index
    %111 = vector.load %arg11[%c0_89, %c33_90] : memref<8x290xbf16, #tpu.memory_space<vmem>>, vector<8x256xbf16>
    %c56 = arith.constant 56 : index
    %c0_91 = arith.constant 0 : index
    %112 = vector.load %arg13[%c56, %c0_91] : memref<72x256xbf16, #tpu.memory_space<vmem>>, vector<8x256xbf16>
    tpu.vector_store %arg13[%c56, %c0_91], %111 {strides = array<i32>} : memref<72x256xbf16, #tpu.memory_space<vmem>>, vector<8x256xbf16>,
    %c0_92 = arith.constant 0 : index
    %c34 = arith.constant 34 : index
    %113 = vector.load %arg11[%c0_92, %c34] : memref<8x290xbf16, #tpu.memory_space<vmem>>, vector<8x256xbf16>
    %114 = vector.broadcast %86 : vector<1x256xbf16> to vector<8x256xbf16>
    %115 = arith.mulf %113, %114 : vector<8x256xbf16>
    %c64 = arith.constant 64 : index
    %c0_93 = arith.constant 0 : index
    %116 = vector.load %arg13[%c64, %c0_93] : memref<72x256xbf16, #tpu.memory_space<vmem>>, vector<8x256xbf16>
    tpu.vector_store %arg13[%c64, %c0_93], %115 {strides = array<i32>} : memref<72x256xbf16, #tpu.memory_space<vmem>>, vector<8x256xbf16>,
    %c0_94 = arith.constant 0 : index
    %c0_95 = arith.constant 0 : index
    %117 = vector.load %arg6[%c0_94, %c0_95] : memref<4x72xbf16, #tpu.memory_space<vmem>>, vector<4x72xbf16>
    %c0_96 = arith.constant 0 : index
    %c0_97 = arith.constant 0 : index
    %118 = vector.load %arg13[%c0_96, %c0_97] : memref<72x256xbf16, #tpu.memory_space<vmem>>, vector<72x256xbf16>
    %cst_98 = arith.constant dense<0.000000e+00> : vector<4x256xf32>
    %119 = tpu.matmul %117, %118, %cst_98 {dimension_numbers = #tpu.dot_dimension_numbers<[1], [0], [0], [1], [0, 0, 1, 1], [], []>} : vector<4x72xbf16>, vector<72x256xbf16>, vector<4x256xf32> -> vector<4x256xf32>
    %c0_99 = arith.constant 0 : index
    %c0_100 = arith.constant 0 : index
    %120 = vector.load %arg8[%c0_99, %c0_100] : memref<4x2xf32, #tpu.memory_space<vmem>>, vector<4x1xf32>
    %121 = vector.broadcast %120 : vector<4x1xf32> to vector<4x256xf32>
    %122 = arith.mulf %119, %121 : vector<4x256xf32>
    %c0_101 = arith.constant 0 : index
    %c1_102 = arith.constant 1 : index
    %123 = vector.load %arg8[%c0_101, %c1_102] : memref<4x2xf32, #tpu.memory_space<vmem>>, vector<4x1xf32>
    %124 = vector.broadcast %123 : vector<4x1xf32> to vector<4x256xf32>
    %125 = arith.addf %122, %124 : vector<4x256xf32>
    %cst_103 = arith.constant 0.000000e+00 : f32
    %126 = vector.broadcast %cst_103 : f32 to vector<4x256xf32>
    %127 = arith.maximumf %125, %126 : vector<4x256xf32>
    %128 = arith.truncf %127 : vector<4x256xf32> to vector<4x256xbf16>
    %c0_104 = arith.constant 0 : index
    %c17_105 = arith.constant 17 : index
    %129 = vector.load %arg12[%c0_104, %c17_105] : memref<4x290xbf16, #tpu.memory_space<vmem>>, vector<4x256xbf16>
    tpu.vector_store %arg12[%c0_104, %c17_105], %128 {strides = array<i32>} : memref<4x290xbf16, #tpu.memory_space<vmem>>, vector<4x256xbf16>,
    %c0_106 = arith.constant 0 : index
    %c0_107 = arith.constant 0 : index
    %130 = vector.load %arg12[%c0_106, %c0_107] : memref<4x290xbf16, #tpu.memory_space<vmem>>, vector<4x256xbf16>
    %131 = vector.broadcast %85 : vector<1x256xbf16> to vector<4x256xbf16>
    %132 = arith.mulf %130, %131 : vector<4x256xbf16>
    %c0_108 = arith.constant 0 : index
    %c0_109 = arith.constant 0 : index
    %133 = vector.load %arg13[%c0_108, %c0_109] : memref<72x256xbf16, #tpu.memory_space<vmem>>, vector<4x256xbf16>
    tpu.vector_store %arg13[%c0_108, %c0_109], %132 {strides = array<i32>} : memref<72x256xbf16, #tpu.memory_space<vmem>>, vector<4x256xbf16>,
    %c0_110 = arith.constant 0 : index
    %c1_111 = arith.constant 1 : index
    %134 = vector.load %arg12[%c0_110, %c1_111] : memref<4x290xbf16, #tpu.memory_space<vmem>>, vector<4x256xbf16>
    %c4_112 = arith.constant 4 : index
    %c0_113 = arith.constant 0 : index
    %135 = vector.load %arg13[%c4_112, %c0_113] : memref<72x256xbf16, #tpu.memory_space<vmem>>, vector<4x256xbf16>
    tpu.vector_store %arg13[%c4_112, %c0_113], %134 {strides = array<i32>} : memref<72x256xbf16, #tpu.memory_space<vmem>>, vector<4x256xbf16>,
    %c0_114 = arith.constant 0 : index
    %c2_115 = arith.constant 2 : index
    %136 = vector.load %arg12[%c0_114, %c2_115] : memref<4x290xbf16, #tpu.memory_space<vmem>>, vector<4x256xbf16>
    %137 = vector.broadcast %86 : vector<1x256xbf16> to vector<4x256xbf16>
    %138 = arith.mulf %136, %137 : vector<4x256xbf16>
    %c8_116 = arith.constant 8 : index
    %c0_117 = arith.constant 0 : index
    %139 = vector.load %arg13[%c8_116, %c0_117] : memref<72x256xbf16, #tpu.memory_space<vmem>>, vector<4x256xbf16>
    tpu.vector_store %arg13[%c8_116, %c0_117], %138 {strides = array<i32>} : memref<72x256xbf16, #tpu.memory_space<vmem>>, vector<4x256xbf16>,
    %c0_118 = arith.constant 0 : index
    %c16_119 = arith.constant 16 : index
    %140 = vector.load %arg12[%c0_118, %c16_119] : memref<4x290xbf16, #tpu.memory_space<vmem>>, vector<4x256xbf16>
    %141 = vector.broadcast %85 : vector<1x256xbf16> to vector<4x256xbf16>
    %142 = arith.mulf %140, %141 : vector<4x256xbf16>
    %c12 = arith.constant 12 : index
    %c0_120 = arith.constant 0 : index
    %143 = vector.load %arg13[%c12, %c0_120] : memref<72x256xbf16, #tpu.memory_space<vmem>>, vector<4x256xbf16>
    tpu.vector_store %arg13[%c12, %c0_120], %142 {strides = array<i32>} : memref<72x256xbf16, #tpu.memory_space<vmem>>, vector<4x256xbf16>,
    %c0_121 = arith.constant 0 : index
    %c17_122 = arith.constant 17 : index
    %144 = vector.load %arg12[%c0_121, %c17_122] : memref<4x290xbf16, #tpu.memory_space<vmem>>, vector<4x256xbf16>
    %c16_123 = arith.constant 16 : index
    %c0_124 = arith.constant 0 : index
    %145 = vector.load %arg13[%c16_123, %c0_124] : memref<72x256xbf16, #tpu.memory_space<vmem>>, vector<4x256xbf16>
    tpu.vector_store %arg13[%c16_123, %c0_124], %144 {strides = array<i32>} : memref<72x256xbf16, #tpu.memory_space<vmem>>, vector<4x256xbf16>,
    %c0_125 = arith.constant 0 : index
    %c18_126 = arith.constant 18 : index
    %146 = vector.load %arg12[%c0_125, %c18_126] : memref<4x290xbf16, #tpu.memory_space<vmem>>, vector<4x256xbf16>
    %147 = vector.broadcast %86 : vector<1x256xbf16> to vector<4x256xbf16>
    %148 = arith.mulf %146, %147 : vector<4x256xbf16>
    %c20 = arith.constant 20 : index
    %c0_127 = arith.constant 0 : index
    %149 = vector.load %arg13[%c20, %c0_127] : memref<72x256xbf16, #tpu.memory_space<vmem>>, vector<4x256xbf16>
    tpu.vector_store %arg13[%c20, %c0_127], %148 {strides = array<i32>} : memref<72x256xbf16, #tpu.memory_space<vmem>>, vector<4x256xbf16>,
    %c0_128 = arith.constant 0 : index
    %c32_129 = arith.constant 32 : index
    %150 = vector.load %arg12[%c0_128, %c32_129] : memref<4x290xbf16, #tpu.memory_space<vmem>>, vector<4x256xbf16>
    %151 = vector.broadcast %85 : vector<1x256xbf16> to vector<4x256xbf16>
    %152 = arith.mulf %150, %151 : vector<4x256xbf16>
    %c24_130 = arith.constant 24 : index
    %c0_131 = arith.constant 0 : index
    %153 = vector.load %arg13[%c24_130, %c0_131] : memref<72x256xbf16, #tpu.memory_space<vmem>>, vector<4x256xbf16>
    tpu.vector_store %arg13[%c24_130, %c0_131], %152 {strides = array<i32>} : memref<72x256xbf16, #tpu.memory_space<vmem>>, vector<4x256xbf16>,
    %c0_132 = arith.constant 0 : index
    %c33_133 = arith.constant 33 : index
    %154 = vector.load %arg12[%c0_132, %c33_133] : memref<4x290xbf16, #tpu.memory_space<vmem>>, vector<4x256xbf16>
    %c28 = arith.constant 28 : index
    %c0_134 = arith.constant 0 : index
    %155 = vector.load %arg13[%c28, %c0_134] : memref<72x256xbf16, #tpu.memory_space<vmem>>, vector<4x256xbf16>
    tpu.vector_store %arg13[%c28, %c0_134], %154 {strides = array<i32>} : memref<72x256xbf16, #tpu.memory_space<vmem>>, vector<4x256xbf16>,
    %c0_135 = arith.constant 0 : index
    %c34_136 = arith.constant 34 : index
    %156 = vector.load %arg12[%c0_135, %c34_136] : memref<4x290xbf16, #tpu.memory_space<vmem>>, vector<4x256xbf16>
    %157 = vector.broadcast %86 : vector<1x256xbf16> to vector<4x256xbf16>
    %158 = arith.mulf %156, %157 : vector<4x256xbf16>
    %c32_137 = arith.constant 32 : index
    %c0_138 = arith.constant 0 : index
    %159 = vector.load %arg13[%c32_137, %c0_138] : memref<72x256xbf16, #tpu.memory_space<vmem>>, vector<4x256xbf16>
    tpu.vector_store %arg13[%c32_137, %c0_138], %158 {strides = array<i32>} : memref<72x256xbf16, #tpu.memory_space<vmem>>, vector<4x256xbf16>,
    %c0_139 = arith.constant 0 : index
    %c0_140 = arith.constant 0 : index
    %160 = vector.load %arg7[%c0_139, %c0_140] : memref<4x36xbf16, #tpu.memory_space<vmem>>, vector<4x36xbf16>
    %c0_141 = arith.constant 0 : index
    %c0_142 = arith.constant 0 : index
    %161 = vector.load %arg13[%c0_141, %c0_142] : memref<72x256xbf16, #tpu.memory_space<vmem>>, vector<36x256xbf16>
    %cst_143 = arith.constant dense<0.000000e+00> : vector<4x256xf32>
    %162 = tpu.matmul %160, %161, %cst_143 {dimension_numbers = #tpu.dot_dimension_numbers<[1], [0], [0], [1], [0, 0, 1, 1], [], []>} : vector<4x36xbf16>, vector<36x256xbf16>, vector<4x256xf32> -> vector<4x256xf32>
    %c0_144 = arith.constant 0 : index
    %c0_145 = arith.constant 0 : index
    %163 = vector.load %arg9[%c0_144, %c0_145] : memref<4x2xf32, #tpu.memory_space<vmem>>, vector<4x1xf32>
    %164 = vector.broadcast %163 : vector<4x1xf32> to vector<4x256xf32>
    %165 = arith.mulf %162, %164 : vector<4x256xf32>
    %c0_146 = arith.constant 0 : index
    %c1_147 = arith.constant 1 : index
    %166 = vector.load %arg9[%c0_146, %c1_147] : memref<4x2xf32, #tpu.memory_space<vmem>>, vector<4x1xf32>
    %167 = vector.broadcast %166 : vector<4x1xf32> to vector<4x256xf32>
    %168 = arith.addf %165, %167 : vector<4x256xf32>
    %cst_148 = arith.constant 0.000000e+00 : f32
    %169 = vector.broadcast %cst_148 : f32 to vector<4x256xf32>
    %170 = arith.maximumf %168, %169 : vector<4x256xf32>
    %c0_149 = arith.constant 0 : index
    %c0_150 = arith.constant 0 : index
    %c0_151 = arith.constant 0 : index
    %171 = vector.load %arg10[%c0_149, %c0_150, %c0_151] : memref<1x4x256xf32, #tpu.memory_space<vmem>>, vector<1x4x256xf32>
    %172 = vector.shape_cast %171 : vector<1x4x256xf32> to vector<4x256xf32>
    %173 = vector.shape_cast %170 : vector<4x256xf32> to vector<1x4x256xf32>
    tpu.vector_store %arg10[%c0_149, %c0_150, %c0_151], %173 {strides = array<i32>} : memref<1x4x256xf32, #tpu.memory_space<vmem>>, vector<1x4x256xf32>,
    return
  }
  func.func @transform_0(%arg0: i32) -> (i32, i32, i32) {
    %c0_i32 = arith.constant 0 : i32
    %c0_i32_0 = arith.constant 0 : i32
    %c0_i32_1 = arith.constant 0 : i32
    return %arg0, %c0_i32, %c0_i32_0 : i32, i32, i32
  }
  func.func @transform_1(%arg0: i32) -> (i32, i32, i32) {
    %c0_i32 = arith.constant 0 : i32
    %c0_i32_0 = arith.constant 0 : i32
    %c0_i32_1 = arith.constant 0 : i32
    return %arg0, %c0_i32, %c0_i32_0 : i32, i32, i32
  }
  func.func @transform_2(%arg0: i32) -> (i32, i32) {
    %c0_i32 = arith.constant 0 : i32
    %c0_i32_0 = arith.constant 0 : i32
    %c0_i32_1 = arith.constant 0 : i32
    return %c0_i32, %c0_i32_0 : i32, i32
  }
  func.func @transform_3(%arg0: i32) -> (i32, i32) {
    %c0_i32 = arith.constant 0 : i32
    %c0_i32_0 = arith.constant 0 : i32
    %c0_i32_1 = arith.constant 0 : i32
    return %c0_i32, %c0_i32_0 : i32, i32
  }
  func.func @transform_4(%arg0: i32) -> (i32, i32) {
    %c0_i32 = arith.constant 0 : i32
    %c0_i32_0 = arith.constant 0 : i32
    %c0_i32_1 = arith.constant 0 : i32
    return %c0_i32, %c0_i32_0 : i32, i32
  }
  func.func @transform_5(%arg0: i32) -> (i32, i32) {
    %c0_i32 = arith.constant 0 : i32
    %c0_i32_0 = arith.constant 0 : i32
    %c0_i32_1 = arith.constant 0 : i32
    return %c0_i32, %c0_i32_0 : i32, i32
  }
  func.func @transform_6(%arg0: i32) -> (i32, i32) {
    %c0_i32 = arith.constant 0 : i32
    %c0_i32_0 = arith.constant 0 : i32
    %c0_i32_1 = arith.constant 0 : i32
    return %c0_i32, %c0_i32_0 : i32, i32
  }
  func.func @transform_7(%arg0: i32) -> (i32, i32) {
    %c0_i32 = arith.constant 0 : i32
    %c0_i32_0 = arith.constant 0 : i32
    %c0_i32_1 = arith.constant 0 : i32
    return %c0_i32, %c0_i32_0 : i32, i32
  }
  func.func @transform_8(%arg0: i32) -> (i32, i32) {
    %c0_i32 = arith.constant 0 : i32
    %c0_i32_0 = arith.constant 0 : i32
    %c0_i32_1 = arith.constant 0 : i32
    return %c0_i32, %c0_i32_0 : i32, i32
  }
  func.func @transform_9(%arg0: i32) -> (i32, i32, i32) {
    %c0_i32 = arith.constant 0 : i32
    %c0_i32_0 = arith.constant 0 : i32
    %c0_i32_1 = arith.constant 0 : i32
    return %arg0, %c0_i32, %c0_i32_0 : i32, i32, i32
  }
}

</mosaic_0001>

<bundles_post_ra>
// kernel: tpu_custom_call.1
= control target key start
LH: loop header
LB: loop body
LE: loop exit
PB: predicated region body
PF: predicated region fallthrough
CT: control target
= control target key end

     0   :  { %14 = vsyncpa [#allocation7], 0  ;;  %s2776_s0 = inlined_call_operand.vmem [shape: f32[2,32,8], index: 0, kind: input, shape index: {}]   ;;  %s2777_s1 = inlined_call_operand.vmem [shape: f32[2,4,256], index: 1, kind: input, shape index: {}]   ;;  %s2778_s2 = inlined_call_operand.vmem [shape: f32[16,8], index: 2, kind: input, shape index: {}]   ;;  %s2779_s3 = inlined_call_operand.vmem [shape: f32[8,16], index: 3, kind: input, shape index: {}]   ;;  %s2780_s4 = inlined_call_operand.vmem [shape: bf16[2,256], index: 4, kind: input, shape index: {}]   ;;  %s2781_s5 = inlined_call_operand.vmem [shape: bf16[4,72], index: 5, kind: input, shape index: {}]   ;;  %s2782_s6 = inlined_call_operand.vmem [shape: bf16[4,36], index: 6, kind: input, shape index: {}]   ;;  %s2783_s7 = inlined_call_operand.vmem [shape: f32[4,2], index: 7, kind: input, shape index: {}]   ;;  %s2784_s8 = inlined_call_operand.vmem [shape: f32[4,2], index: 8, kind: input, shape index: {}]   ;;  %s2785_s9 = inlined_call_operand.hbm [shape: f32[2,4,256], index: 9, kind: output, shape index: {}]  }
   0x1   :  { %16 = vsyncpa [#allocation7 + $0x1], 0  ;;  %s2293_s30 = smov 0   ;;  %s2295_s10 = smov 0  }
   0x2   :  { %s2297_s11 = smov 0   ;;  %s2299_s12 = smov 0  }
   0x3 LB: > { %s2314_s13 = sadd.s32 4294967295, %s2215_s12   ;;  %s1942_s14 = sadd.s32 4294967294, %s2215_s12   ;;  %s2215_s12 = sphi %s2299_s12, %s2813_s12   ;;  %s2211_s11 = sphi %s2297_s11, %s2812_s11   ;;  %s2207_s10 = sphi %s2295_s10, %s2811_s10   ;;  %s2203_s30 = sphi %s2293_s30, %s2810_s30  }
   0x4   : > { %s2318_s15 = sadd.s32 1, %s2215_s12   ;;  %s228_s16 = sadd.s32 1, %s2211_s11 }
   0x5   : > { %s225_s17 = ssub.s32 %s2215_s12, %s2318_s15  ;;  %p238_p0 = scmp.ne.s32.totalorder %s2211_s11, %s2207_s10 }
   0x6   : > { %p226_p1 = scmp.eq.s32.totalorder %s225_s17, 0  ;;  %p239_p2 = scmp.eq.s32.totalorder %s2314_s13, 1 }
   0x7   : > { %p244_p3 = scmp.ne.s32.totalorder %s2207_s10, %s2203_s30  ;;  %p245_p4 = scmp.eq.s32.totalorder %s1942_s14, 1 }
   0x8   : > { %s2329_s18 = scalar_select %p226_p1, %s2211_s11, %s228_s16  }
   0x9   : > { %p2331_p5 = por %p239_p2, %p238_p0  ;;  %p2335_p6 = por %p245_p4, %p244_p3 }
   0xa   : > { %p1945_p7 = scmp.ge.s32.totalorder %s2215_s12, 1  ;;  %p300_p8 = scmp.lt.s32.totalorder %s2215_s12, 3 }
   0xc   : > { %p301_p9 = pnand %p1945_p7, %p300_p8 }
   0xd   : > { %p341_p10 = scmp.lt.s32.totalorder (!%p301_p9), %s2314_s13, 1  ;;  %v383_v0 = vld [vmem:[%s2778_s2] sm:$0xff] (!%p301_p9)  ;;  %vm386_vm0 = vcmask (!%p301_p9), 64512   ;;  %v384_v2 = vld [vmem:[%s2778_s2 + $0x8] sm:$0xff] (!%p301_p9)  ;;  %v2217_v23 = vmov (!%p301_p9), 1966171168   ;;  %v1114_v25 = vlaneseq (!%p301_p9) }
   0xe   : > { %304 = sbr.rel (%p301_p9) target bundleno = 1540 (0x604), region = 56  ;;  %2041 = vmatprep.mubr.msk.f32.mxu0 (!%p301_p9), %vm386_vm0, %v383_v0  ;;  %2046 = vmatprep.mubr.msk.f32.mxu1 (!%p301_p9), %vm386_vm0, %v383_v0  ;;  %v736_v6 = vld [vmem:[%s2779_s3] sm:$0xff] (!%p301_p9)  ;;  %v1112_v24 = vunpack.c.l.s4 (!%p301_p9), %v2217_v23  ;;  %vm888_vm1 = vcmask (!%p301_p9), 1045509   ;;  %vm891_vm2 = vcmask (!%p301_p9), 1046534   ;;  %vm894_vm3 = vcmask (!%p301_p9), 1047559   ;;  %s2218_s22 = smov (!%p301_p9), 1  }
   0xf   : > { %v2382_v27 = vshrl.u32 (!%p301_p9), %v1114_v25, 7  ;;  %v2390_v33 = vld.sshfl [vmem:[%s2780_s4] sm:$0x11 pattern:$0x75316420] (!%p301_p9)  ;;  %s2220_s25 = smov (!%p301_p9), 33  }
  0x10   : > { %v1113_v26 = vunpack.c.0.s8 (!%p301_p9), %v1112_v24  ;;  %v1110_v39 = vcombine.high (!%p301_p9), %v2390_v33, %v2390_v33  ;;  %s2221_s26 = smov (!%p301_p9), 49   ;;  %s2222_s14 = smov (!%p301_p9), 65   ;;  %vm352_vm4 = vcmask (!%p301_p9), 134144   ;;  %vm354_vm5 = vcmask (!%p301_p9), 273544  }
  0x11   : > { %s2223_s16 = smov (!%p301_p9), 81   ;;  %s2224_s17 = smov (!%p301_p9), 113   ;;  %vm356_vm6 = vcmask (!%p301_p9), 132096   ;;  %vm900_vm7 = vcmask (!%p301_p9), 265354   ;;  %vm913_vm8 = vcmask (!%p301_p9), 396554   ;;  %vm926_vm9 = vcmask (!%p301_p9), 527754  }
  0x12   : > { %v2385_v31 = vsub.s32 (!%p301_p9), %v1113_v26, %v2382_v27  ;;  %s2226_s21 = smov (!%p301_p9), 97   ;;  %s2231_s28 = smov (!%p301_p9), 32   ;;  %vm939_vm10 = vcmask (!%p301_p9), 658954   ;;  %vm951_vm11 = vcmask (!%p301_p9), 790154   ;;  %vm978_vm12 = vcmask (!%p301_p9), 1044362  }
  0x13   : > { %vm979_vm13 = vcmask (!%p301_p9), 7174   ;;  %vm975_vm14 = vcmask (!%p301_p9), 924672   ;;  %vm963_vm15 = vcmask (!%p301_p9), 921354  }
  0x14   : > { %v2400_v40 = vrot.slane (!%p301_p9), %v2390_v33, %v2385_v31 }
  0x15   : > { %s2348_s23 = scalar_select %p341_p10, %s2314_s13, 1 }
  0x17   : > { %s2006_s24 = sshll.u32 %s2348_s23, 5 }
  0x18   : > { %s345_s27 = scalar_lea.vmem %s2776_s0, %s2006_s24  ;;  %s2219_s24 = smov 17  }
  0x19   : > { %v385_v1 = vld [vmem:[%s345_s27] sm:$0xff]  ;;  %v472_v3 = vld [vmem:[%s345_s27 + $0x8] sm:$0xff]  ;;  %v558_v4 = vld [vmem:[%s345_s27 + $0x10] sm:$0xff] }
  0x1a   : > { %2039 = vmatprep.subr.mxu0 %v385_v1  ;;  %2044 = vmatprep.subr.mxu1 %v472_v3  ;;  %v644_v5 = vld [vmem:[%s345_s27 + $0x18] sm:$0xff]  ;;  %s2007_s27 = sshll.u32 %s2348_s23, 3  ;;  %s2230_s23 = smov 34  }
  0x1b   : > { %2040 = vmatpush3.msra.mxu0 %v385_v1  ;;  %2045 = vmatpush3.msra.mxu1 %v472_v3  ;;  %s350_s29 = scalar_lea.vmem %s2777_s1, %s2007_s27  ;;  %s2229_s27 = smov 16  }
  0x1c   : > { %2042 = vmatmul.mubr.msk.f32.vlgmr.msra.gmra.mrb[0].mxu0 %vm386_vm0, %v384_v2  ;;  %2047 = vmatmul.mubr.msk.f32.vlgmr.msra.gmra.mrb[0].mxu1 %vm386_vm0, %v384_v2 }
  0x1d   : > { %2049 = vmatprep.subr.mxu0 %v558_v4  ;;  %2051 = vmatprep.mubr.msk.f32.mxu0 %vm386_vm0, %v383_v0 }
  0x1e   : > { %2050 = vmatpush3.msra.mxu0 %v558_v4  ;;  %2054 = vmatprep.subr.mxu1 %v644_v5 }
  0x1f   : > { %2055 = vmatpush3.msra.mxu1 %v644_v5  ;;  %2056 = vmatprep.mubr.msk.f32.mxu1 %vm386_vm0, %v383_v0 }
  0x20   : > { %2052 = vmatmul.mubr.msk.f32.vlgmr.msra.gmra.mrb[2].mxu0 %vm386_vm0, %v384_v2  ;;  %2057 = vmatmul.mubr.msk.f32.vlgmr.msra.gmra.mrb[2].mxu1 %vm386_vm0, %v384_v2 }
  0x21   : > { %2059 = vmatprep.subr.mxu0 %v736_v6 }
  0x22   : > { %2060 = vmatpush3.msra.mxu0 %v736_v6 }
  0xef   : > { %v2043_v7 = vpop.f32.mrb[0].mxu0  ;;  %v2048_v8 = vpop.f32.mrb[0].mxu1 }
  0xf0   : > { %469 = vst.msk [vmem:[#allocation5 + $0x8] sm:$0xff] %vm386_vm0, %v2043_v7  ;;  %v459_v9 = vpop.f32.mrb[1].mxu0  ;;  %555 = vst.msk [vmem:[#allocation5 + $0x18] sm:$0xff] %vm386_vm0, %v2048_v8  ;;  %v545_v10 = vpop.f32.mrb[1].mxu1 }
  0xf1   : > { %468 = vst.msk [vmem:[#allocation5] sm:$0xff] %vm386_vm0, %v459_v9  ;;  %554 = vst.msk [vmem:[#allocation5 + $0x10] sm:$0xff] %vm386_vm0, %v545_v10 }
  0xf3   : > { %v2053_v11 = vpop.f32.mrb[2].mxu0  ;;  %v2058_v12 = vpop.f32.mrb[2].mxu1 }
  0xf4   : > { %641 = vst.msk [vmem:[#allocation5 + $0x28] sm:$0xff] %vm386_vm0, %v2053_v11  ;;  %v631_v13 = vpop.f32.mrb[3].mxu0  ;;  %727 = vst.msk [vmem:[#allocation5 + $0x38] sm:$0xff] %vm386_vm0, %v2058_v12  ;;  %v717_v14 = vpop.f32.mrb[3].mxu1 }
  0xf5   : > { %640 = vst.msk [vmem:[#allocation5 + $0x20] sm:$0xff] %vm386_vm0, %v631_v13  ;;  %726 = vst.msk [vmem:[#allocation5 + $0x30] sm:$0xff] %vm386_vm0, %v717_v14 }
  0xf7   : > { %v729_v17 = vld [vmem:[#allocation5 + $0x8] sm:$0xff]  ;;  %v731_v19 = vld [vmem:[#allocation5 + $0x18] sm:$0xff] }
  0xf8   : > { %v728_v15 = vld [vmem:[#allocation5] sm:$0xff]  ;;  %v730_v16 = vld [vmem:[#allocation5 + $0x10] sm:$0xff] }
  0xf9   : > { %2061 = vmatprep.mubr.msk.f32.mxu0 %vm386_vm0, %v728_v15 }
  0xfa   : > { %2062 = vmatmul.mubr.msk.f32.vlgmr.msra.gmra.mrb[4].mxu0 %vm386_vm0, %v729_v17 }
  0xfb   : > { %2064 = vmatprep.mubr.msk.f32.mxu0 %vm386_vm0, %v730_v16  ;;  %v733_v21 = vld [vmem:[#allocation5 + $0x28] sm:$0xff]  ;;  %v735_v22 = vld [vmem:[#allocation5 + $0x38] sm:$0xff] }
  0xfc   : > { %v732_v18 = vld [vmem:[#allocation5 + $0x20] sm:$0xff]  ;;  %v734_v20 = vld [vmem:[#allocation5 + $0x30] sm:$0xff] }
  0xfe   : > { %2065 = vmatmul.mubr.msk.f32.gmra.mrb[6].mxu0 %vm386_vm0, %v731_v19 }
  0xff   : > { %2067 = vmatprep.mubr.msk.f32.mxu0 %vm386_vm0, %v732_v18 }
 0x102   : > { %2068 = vmatmul.mubr.msk.f32.gmra.mrb[8].mxu0 %vm386_vm0, %v733_v21 }
 0x103   : > { %2070 = vmatprep.mubr.msk.f32.mxu0 %vm386_vm0, %v734_v20 }
 0x106   : > { %2071 = vmatmul.mubr.msk.f32.gmra.mrb[10].mxu0 %vm386_vm0, %v735_v22  ;;  %vm2579_vm0 = vmor %vm979_vm13, %vm978_vm12  ;;  %vm1159_vm12 = vcmask 1039360   ;;  %vm1241_vm13 = vcmask 908288  }
 0x1cd   : > { %v2063_v28 = vpop.f32.mrb[4].mxu0 }
 0x1ce   : > { %v2013_v29 = vpack.c.bf16 %v2063_v28, %v2063_v28  ;;  %v827_v30 = vpop.f32.mrb[5].mxu0 }
 0x1cf   : > { %v2009_v32 = vpack.c.bf16 %v827_v30, %v827_v30 }
 0x1d0   : > { %v2392_v34 = vunpack.c.l.b16 %v2013_v29 }
 0x1d1   : > { %v2394_v35 = vunpack.c.l.b16 %v2009_v32  ;;  %v2066_v36 = vpop.f32.mrb[6].mxu0 }
 0x1d2   : > { %v2014_v37 = vpack.c.bf16 %v2066_v36, %v2066_v36  ;;  %v837_v38 = vpop.f32.mrb[7].mxu0  ;;  %v1006_v42 = vrot.slane %v2392_v34, 4  ;;  %v1018_v43 = vrot.slane %v2392_v34, 5  ;;  %v1030_v44 = vrot.slane %v2392_v34, 6 }
 0x1d3   : > { %v2010_v41 = vpack.c.bf16 %v837_v38, %v837_v38  ;;  %v982_v46 = vrot.slane %v2394_v35, 3  ;;  %v915_v47 = vrot.slane %v2394_v35, 6  ;;  %v886_v48 = vrot.slane %v2394_v35, 4 }
 0x1d4   : > { %v2405_v45 = vunpack.c.l.b16 %v2014_v37  ;;  %v928_v51 = vrot.slane %v2394_v35, 7  ;;  %v902_v52 = vrot.slane %v2394_v35, 5  ;;  %v965_v53 = vrot.slane %v2394_v35, 2 }
 0x1d5   : > { %v2410_v49 = vunpack.c.l.b16 %v2010_v41  ;;  %v2069_v50 = vpop.f32.mrb[8].mxu0 }
 0x1d6   : > { %v2015_v54 = vpack.c.bf16 %v2069_v50, %v2069_v50  ;;  %v847_v55 = vpop.f32.mrb[9].mxu0  ;;  %v1007_v56 = vrot.slane %v2405_v45, 3  ;;  %v1019_v57 = vrot.slane %v2405_v45, 4  ;;  %v1031_v58 = vrot.slane %v2405_v45, 5 }
 0x1d7   : > { %v2011_v59 = vpack.c.bf16 %v847_v55, %v847_v55  ;;  %v983_v60 = vrot.slane %v2410_v49, 2  ;;  %v916_v61 = vrot.slane %v2410_v49, 5  ;;  %v887_v62 = vrot.slane %v2410_v49, 3 }
 0x1d8   : > { %v2421_v63 = vunpack.c.l.b16 %v2015_v54  ;;  %v1008_v0 = vsel %vm888_vm1, %v1007_v56, %v1006_v42  ;;  %v1020_v1 = vsel %vm888_vm1, %v1019_v57, %v1018_v43  ;;  %v1032_v2 = vsel %vm888_vm1, %v1031_v58, %v1030_v44 }
 0x1d9   : > { %v2426_v3 = vunpack.c.l.b16 %v2011_v59  ;;  %v2072_v4 = vpop.f32.mrb[10].mxu0  ;;  %v984_v5 = vsel %vm888_vm1, %v983_v60, %v982_v46  ;;  %v917_v6 = vsel %vm888_vm1, %v916_v61, %v915_v47  ;;  %v889_v7 = vsel %vm888_vm1, %v887_v62, %v886_v48 }
 0x1da   : > { %v2016_v8 = vpack.c.bf16 %v2072_v4, %v2072_v4  ;;  %v857_v9 = vpop.f32.mrb[11].mxu0  ;;  %v1009_v10 = vrot.slane %v2421_v63, 2  ;;  %v1021_v11 = vrot.slane %v2421_v63, 3  ;;  %v1033_v12 = vrot.slane %v2421_v63, 4 }
 0x1db   : > { %v2012_v13 = vpack.c.bf16 %v857_v9, %v857_v9  ;;  %v985_v14 = vrot.slane %v2426_v3, 1  ;;  %v918_v15 = vrot.slane %v2426_v3, 4  ;;  %v890_v16 = vrot.slane %v2426_v3, 2 }
 0x1dc   : > { %v2437_v17 = vunpack.c.l.b16 %v2016_v8  ;;  %v1010_v18 = vsel %vm891_vm2, %v1009_v10, %v1008_v0  ;;  %v1022_v19 = vsel %vm891_vm2, %v1021_v11, %v1020_v1  ;;  %v1034_v20 = vsel %vm891_vm2, %v1033_v12, %v1032_v2 }
 0x1dd   : > { %v2442_v21 = vunpack.c.l.b16 %v2012_v13  ;;  %v986_v22 = vsel %vm891_vm2, %v985_v14, %v984_v5  ;;  %v919_v23 = vsel %vm891_vm2, %v918_v15, %v917_v6  ;;  %v892_v24 = vsel %vm891_vm2, %v890_v16, %v889_v7 }
 0x1de   : > { %v1011_v25 = vrot.slane %v2437_v17, 1  ;;  %v1023_v26 = vrot.slane %v2437_v17, 2  ;;  %v1035_v28 = vrot.slane %v2437_v17, 3  ;;  %v929_v29 = vrot.slane %v2410_v49, 6 }
 0x1df   : > { %v987_v30 = vsel %vm894_vm3, %v2442_v21, %v986_v22  ;;  %v920_v32 = vrot.slane %v2442_v21, 3  ;;  %v893_v36 = vrot.slane %v2442_v21, 1  ;;  %v931_v37 = vrot.slane %v2426_v3, 5 }
 0x1e0   : > { %v988_v38 = vpack.c.b16 %v987_v30, %v987_v30  ;;  %v1012_v41 = vsel %vm894_vm3, %v1011_v25, %v1010_v18  ;;  %v1024_v42 = vsel %vm894_vm3, %v1023_v26, %v1022_v19  ;;  %v1036_v43 = vsel %vm894_vm3, %v1035_v28, %v1034_v20 }
 0x1e1   : > { %v1013_v44 = vpack.c.b16 %v1012_v41, %v1012_v41  ;;  %v921_v46 = vsel %vm894_vm3, %v920_v32, %v919_v23  ;;  %v1042_v47 = vrot.slane %v2392_v34, 7  ;;  %v953_v48 = vrot.slane %v2394_v35, 1 }
 0x1e2   : > { %989 = vrot.lane.b32.xlu1 %v988_v38, %s2218_s22  ;;  %v895_v50 = vsel %vm894_vm3, %v893_v36, %v892_v24  ;;  %v930_v54 = vsel %vm888_vm1, %v929_v29, %v928_v51  ;;  %v933_v55 = vrot.slane %v2442_v21, 4  ;;  %v1076_v56 = vrot.slane %v2392_v34, 2 }
 0x1e3   : > { %1014 = vrot.lane.b32.xlu0 %v1013_v44, %s2219_s24  ;;  %v1025_v57 = vpack.c.b16 %v1024_v42, %v1024_v42  ;;  %v932_v58 = vsel %vm891_vm2, %v931_v37, %v930_v54  ;;  %v903_v59 = vrot.slane %v2410_v49, 4  ;;  %v905_v60 = vrot.slane %v2426_v3, 3 }
 0x1e4   : > { %v934_v61 = vsel %vm894_vm3, %v933_v55, %v932_v58  ;;  %v907_v62 = vrot.slane %v2442_v21, 2  ;;  %v941_v51 = vrot.slane %v2410_v49, 7  ;;  %v943_v0 = vrot.slane %v2426_v3, 6 }
 0x1e5   : > { %v1037_v1 = vpack.c.b16 %v1036_v43, %v1036_v43  ;;  %v904_v2 = vsel %vm888_vm1, %v903_v59, %v902_v52  ;;  %v945_v4 = vrot.slane %v2442_v21, 5  ;;  %v966_v5 = vrot.slane %v2410_v49, 1 }
 0x1e6   : > { %1026 = vrot.lane.b32.xlu1 %v1025_v57, %s2220_s25  ;;  %v906_v6 = vsel %vm891_vm2, %v905_v60, %v904_v2  ;;  %v942_v7 = vsel %vm888_vm1, %v941_v51, %v2394_v35  ;;  %v969_v8 = vrot.slane %v2442_v21, 7  ;;  %v1043_v9 = vrot.slane %v2405_v45, 6 }
 0x1e7   : > { %1038 = vrot.lane.b32.xlu0 %v1037_v1, %s2221_s26  ;;  %v908_v52 = vsel %vm894_vm3, %v907_v62, %v906_v6  ;;  %v944_v10 = vsel %vm891_vm2, %v943_v0, %v942_v7  ;;  %v967_v11 = vsel %vm888_vm1, %v966_v5, %v965_v53  ;;  %v1045_v12 = vrot.slane %v2421_v63, 5 }
 0x1e8   : > { %v922_v13 = vpack.c.b16 %v921_v46, %v921_v46  ;;  %v946_v14 = vsel %vm894_vm3, %v945_v4, %v944_v10  ;;  %v968_v15 = vsel %vm891_vm2, %v2426_v3, %v967_v11  ;;  %v1044_v16 = vsel %vm888_vm1, %v1043_v9, %v1042_v47  ;;  %v360_v46 = vld [vmem:[%s350_s29] sm:$0xff]  ;;  %s2233_s29 = smov 111  }
 0x1e9   : > { %v896_v18 = vpack.c.b16 %v895_v50, %v895_v50  ;;  %v970_v19 = vsel %vm894_vm3, %v969_v8, %v968_v15  ;;  %v1046_v20 = vsel %vm891_vm2, %v1045_v12, %v1044_v16  ;;  %v1047_v22 = vrot.slane %v2437_v17, 4 }
 0x1ea   : > { %923 = vrot.lane.b32.xlu1 %v922_v13, %s2221_s26  ;;  %v935_v35 = vpack.c.b16 %v934_v61, %v934_v61  ;;  %v954_v53 = vsel %vm888_vm1, %v2410_v49, %v953_v48  ;;  %v955_v23 = vrot.slane %v2426_v3, 7  ;;  %v957_v24 = vrot.slane %v2442_v21, 6  ;;  %s2228_s26 = smov 18  }
 0x1eb   : > { %897 = vrot.lane.b32.xlu0 %v896_v18, %s2219_s24  ;;  %v1048_v25 = vsel %vm894_vm3, %v1047_v22, %v1046_v20  ;;  %v1077_v26 = vrot.slane %v2405_v45, 1  ;;  %v1080_v28 = vrot.slane %v2437_v17, 7  ;;  %v1065_v29 = vrot.slane %v2392_v34, 1 }
 0x1ec   : > { %v909_v30 = vpack.c.b16 %v908_v52, %v908_v52  ;;  %v956_v32 = vsel %vm891_vm2, %v955_v23, %v954_v53  ;;  %v1067_v49 = vrot.slane %v2421_v63, 7  ;;  %v1069_v3 = vrot.slane %v2437_v17, 6 }
 0x1ed   : > { %v958_v21 = vsel %vm894_vm3, %v957_v24, %v956_v32  ;;  %v1078_v36 = vsel %vm888_vm1, %v1077_v26, %v1076_v56  ;;  %v1066_v37 = vsel %vm888_vm1, %v2405_v45, %v1065_v29  ;;  %v1054_v38 = vrot.slane %v2405_v45, 7 }
 0x1ee   : > { %936 = vrot.lane.b32.xlu1 %v935_v35, %s2222_s14  ;;  %v1079_v41 = vsel %vm891_vm2, %v2421_v63, %v1078_v36  ;;  %v1068_v42 = vsel %vm891_vm2, %v1067_v49, %v1066_v37  ;;  %v1056_v43 = vrot.slane %v2421_v63, 6  ;;  %v1124_v44 = vrot.slane %v1110_v39, %v2385_v31 }
 0x1ef   : > { %910 = vrot.lane.b32.xlu0 %v909_v30, %s2220_s25  ;;  %v1081_v47 = vsel %vm894_vm3, %v1080_v28, %v1079_v41  ;;  %v1070_v48 = vsel %vm894_vm3, %v1069_v3, %v1068_v42  ;;  %v1055_v50 = vsel %vm888_vm1, %v1054_v38, %v2392_v34  ;;  %v1058_v54 = vrot.slane %v2437_v17, 5  ;;  %s2227_s25 = smov 2  }
 0x1f0   : > { %v947_v55 = vpack.c.b16 %v946_v14, %v946_v14  ;;  %v971_v56 = vpack.c.b16 %v970_v19, %v970_v19  ;;  %v1057_v57 = vsel %vm891_vm2, %v1056_v43, %v1055_v50  ;;  %v1089_v58 = vrot.slane %v2392_v34, 3 }
 0x1f1   : > { %v1059_v31 = vsel %vm894_vm3, %v1058_v54, %v1057_v57  ;;  %v1090_v33 = vrot.slane %v2405_v45, 2  ;;  %v1092_v39 = vrot.slane %v2421_v63, 1  ;;  %v362_v59 = vcombine.high %v360_v46, %v360_v46 }
 0x1f2   : > { %948 = vrot.lane.b32.xlu1 %v947_v55, %s2223_s16  ;;  %v1165_v60 = vshrl.u32 %v2400_v40, 16  ;;  %v1172_v61 = vshrl.u32 %v1124_v44, 16  ;;  %v2225_v51 = vmov 0   ;;  %v1049_v34 = vpack.c.b16 %v1048_v25, %v1048_v25 }
 0x1f3   : > { %972 = vrot.lane.b32.xlu0 %v971_v56, %s2224_s17  ;;  %v1091_v62 = vsel %vm888_vm1, %v1090_v33, %v1089_v58  ;;  %353 = vst.msk [vmem:[#allocation2] sm:$0xf] %vm352_vm4, %v2225_v51  ;;  %1430 = vmatprep.mubr.bf16.mxu1 %v2225_v51  ;;  %v959_v63 = vpack.c.b16 %v958_v21, %v958_v21  ;;  %v1130_v2 = vsub.s32 0, %v2382_v27  ;;  %vm992_vm1 = vcmask 134154  }
 0x1f4   : > { %v1093_v45 = vsel %vm891_vm2, %v1092_v39, %v1091_v62  ;;  %2137 = vset.pattern.permute.xlu0 %v2225_v51  ;;  %1826 = vmatprep.mubr.bf16.mxu0 %v2225_v51  ;;  %v2008_v1 = vpack.c.bf16 %v362_v59, %v360_v46  ;;  %v1166_v4 = vpack.i.b16 %v1165_v60, %v1165_v60  ;;  %vm378_vm2 = vcmask 1041544  }
 0x1f5   : > { %v1094_v0 = vsel %vm894_vm3, %v2437_v17, %v1093_v45  ;;  %v1173_v5 = vpack.i.b16 %v1172_v61, %v1172_v61  ;;  %355 = vst.msk [vmem:[#allocation2 + $0x8] sm:$0xf] %vm354_vm5, %v2225_v51  ;;  %v1082_v6 = vpack.c.b16 %v1081_v47, %v1081_v47  ;;  %v1126_v8 = vpack.i.b16 %v2400_v40, %v2400_v40 }
 0x1f6   : > { %1050 = vrot.lane.b32.xlu1 %v1049_v34, %s2222_s14  ;;  %357 = vst.msk [vmem:[#allocation3] sm:$0x3] %vm356_vm6, %v2225_v51  ;;  %v1171_v17 = vrot.slane %v1166_v4, %v1130_v2  ;;  %v1133_v9 = vpack.i.b16 %v1124_v44, %v1124_v44  ;;  %v1071_v52 = vpack.c.b16 %v1070_v48, %v1070_v48  ;;  %vm379_vm3 = vcmask 1045508   ;;  %s2790_s14 = smov 95  }
 0x1f7   : > { %960 = vrot.lane.b32.xlu0 %v959_v63, %s2226_s21  ;;  %v1178_v7 = vrot.slane %v1173_v5, %v1130_v2  ;;  %v1060_v10 = vpack.c.b16 %v1059_v31, %v1059_v31  ;;  %v1131_v12 = vrot.slane %v1126_v8, %v1130_v2  ;;  %v1095_v14 = vpack.c.b16 %v1094_v0, %v1094_v0  ;;  %vm380_vm5 = vmor %vm379_vm3, %vm378_vm2 }
 0x1f8   : > { %v1138_v13 = vrot.slane %v1133_v9, %v1130_v2  ;;  %vm374_vm4 = vcmask 138240   ;;  %vm2794_vm3 = vcmask 785408  }
 0x1f9   : > { %v2558_v11 = vcombine.low %v1171_v17, %v1178_v7 }
 0x1fa   : > { %371 = vrot.lane.b32.xlu1 %v2008_v1, %s2219_s24  ;;  %v2564_v15 = vcombine.low %v1131_v12, %v1138_v13 }
 0x1fb   : > { %1083 = vrot.lane.b32.xlu0 %v1082_v6, %s2224_s17  ;;  %s2788_s17 = smov 112  }
 0x1fe   : > { %1072 = vrot.lane.b32.xlu1 %v1071_v52, %s2226_s21  ;;  %s2237_s21 = smov 110  }
 0x1ff   : > { %1061 = vrot.lane.b32.xlu0 %v1060_v10, %s2223_s16  ;;  %s2786_s16 = smov 126  }
 0x202   : > { %1184 = vrot.lane.b32.xlu1 %v2558_v11, %s2227_s25 }
 0x203   : > { %1096 = vrot.lane.b32.xlu0 %v1095_v14, %s2218_s22  ;;  %s2792_s22 = smov 127   ;;  %v1439_v14 = vld [vmem:[%s2783_s7] sm:$0xf] }
 0x206   : > { %1247 = vrot.lane.b32.xlu1 %v2558_v11, %s2228_s26 }
 0x207   : > { %1208 = vrot.lane.b32.xlu0 %v2564_v15, %s2229_s27 }
 0x20a   : > { %1310 = vrot.lane.b32.xlu1 %v2558_v11, %s2230_s23 }
 0x20b   : > { %1271 = vrot.lane.b32.xlu0 %v2564_v15, %s2231_s28 }
 0x254   : > { %v990_v40 = vpop.permute.xlu1 %989 }
 0x255   : > { %v1015_v16 = vpop.permute.xlu0 %1014 }
 0x258   : > { %v1027_v18 = vpop.permute.xlu1 %1026 }
 0x259   : > { %v1039_v19 = vpop.permute.xlu0 %1038 }
 0x25c   : > { %v924_v20 = vpop.permute.xlu1 %923 }
 0x25d   : > { %v898_v22 = vpop.permute.xlu0 %897 }
 0x25e   : > { %901 = vst.msk [vmem:[#allocation2] sm:$0xc] %vm900_vm7, %v898_v22 }
 0x260   : > { %v937_v35 = vpop.permute.xlu1 %936 }
 0x261   : > { %v911_v53 = vpop.permute.xlu0 %910 }
 0x262   : > { %914 = vst.msk [vmem:[#allocation2] sm:$0xc] %vm913_vm8, %v911_v53 }
 0x263   : > { %927 = vst.msk [vmem:[#allocation2] sm:$0xc] %vm926_vm9, %v924_v20 }
 0x264   : > { %v949_v23 = vpop.permute.xlu1 %948  ;;  %940 = vst.msk [vmem:[#allocation2] sm:$0xc] %vm939_vm10, %v937_v35 }
 0x265   : > { %952 = vst.msk [vmem:[#allocation2] sm:$0xc] %vm951_vm11, %v949_v23  ;;  %v973_v24 = vpop.permute.xlu0 %972 }
 0x266   : > { %v974_v25 = vrot.slane %v973_v24, 4 }
 0x268   : > { %v1051_v26 = vpop.permute.xlu1 %1050  ;;  %v976_v30 = vsel %vm975_vm14, %v974_v25, %v973_v24 }
 0x269   : > { %v961_v29 = vpop.permute.xlu0 %960 }
 0x26a   : > { %964 = vst.msk [vmem:[#allocation2] sm:$0xc] %vm963_vm15, %v961_v29 }
 0x26b   : > { %981 = vst.msk [vmem:[#allocation2] sm:$0xcc] %vm2579_vm0, %v976_v30 }
 0x26c   : > { %v372_v32 = vpop.permute.xlu1 %371  ;;  %993 = vst.msk [vmem:[#allocation2 + $0x4] sm:$0xc] %vm992_vm1, %v990_v40  ;;  %v2240_v40 = vmov 1  }
 0x26d   : > { %v373_v49 = vrot.slane %v372_v32, 4  ;;  %v1084_v3 = vpop.permute.xlu0 %1083  ;;  %1017 = vst.msk [vmem:[#allocation2 + $0x4] sm:$0xc] %vm900_vm7, %v1015_v16  ;;  %vm1211_vm7 = vcmask 130048   ;;  %2138 = vset.pattern.permute.xlu1 %v2240_v40 }
 0x26e   : > { %1029 = vst.msk [vmem:[#allocation2 + $0x4] sm:$0xc] %vm913_vm8, %v1027_v18  ;;  %v1085_v36 = vrot.slane %v1084_v3, 4  ;;  %vm1250_vm8 = vcmask 146432  }
 0x26f   : > { %v375_v21 = vsel %vm374_vm4, %v373_v49, %v372_v32  ;;  %382 = vst.msk [vmem:[#allocation2 + $0x8] sm:$0x3] %vm356_vm6, %v373_v49  ;;  %vm1187_vm6 = vcmask 15360  }
 0x270   : > { %1041 = vst.msk [vmem:[#allocation2 + $0x4] sm:$0xc] %vm926_vm9, %v1039_v19  ;;  %v1073_v38 = vpop.permute.xlu1 %1072  ;;  %v1086_v41 = vsel %vm975_vm14, %v1085_v36, %v1084_v3  ;;  %vm1274_vm9 = vcmask 261120   ;;  %vm1304_vm14 = vcmask 777216  }
 0x271   : > { %381 = vst.msk [vmem:[#allocation2] sm:$0x33] %vm380_vm5, %v375_v21  ;;  %v1062_v37 = vpop.permute.xlu0 %1061  ;;  %vm2795_vm5 = vcmask 769024  }
 0x272   : > { %1053 = vst.msk [vmem:[#allocation2 + $0x4] sm:$0xc] %vm939_vm10, %v1051_v26  ;;  %vm1313_vm10 = vcmask 277504  }
 0x273   : > { %1064 = vst.msk [vmem:[#allocation2 + $0x4] sm:$0xc] %vm951_vm11, %v1062_v37  ;;  %vm1157_vm11 = vcmask 1043456  }
 0x274   : > { %1075 = vst.msk [vmem:[#allocation2 + $0x4] sm:$0xc] %vm963_vm15, %v1073_v38  ;;  %v1185_v46 = vpop.permute.xlu1 %1184  ;;  %vm2797_vm15 = vcmask 1031168  }
 0x275   : > { %1088 = vst.msk [vmem:[#allocation2 + $0x4] sm:$0xcc] %vm2579_vm0, %v1086_v41  ;;  %v1097_v42 = vpop.permute.xlu0 %1096  ;;  %v1186_v48 = vrot.slane %v1185_v46, 4  ;;  %vm1226_vm0 = vcmask 916480  }
 0x276   : > { %1099 = vst.msk [vmem:[#allocation2 + $0x8] sm:$0xc] %vm992_vm1, %v1097_v42  ;;  %vm2796_vm1 = vcmask 900096  }
 0x277   : > { %v1188_v55 = vsel %vm1187_vm6, %v1186_v48, %v1185_v46 }
 0x278   : > { %v1248_v57 = vpop.permute.xlu1 %1247 }
 0x279   : > { %v1209_v50 = vpop.permute.xlu0 %1208  ;;  %v1249_v39 = vrot.slane %v1248_v57, 4 }
 0x27a   : > { %v1210_v56 = vrot.slane %v1209_v50, 4 }
 0x27b   : > { %v1251_v45 = vsel %vm1250_vm8, %v1249_v39, %v1248_v57 }
 0x27c   : > { %v1101_v43 = vld [vmem:[#allocation2] sm:$0xff]  ;;  %v1212_v59 = vsel %vm1211_vm7, %v1210_v56, %v1209_v50  ;;  %v1311_v0 = vpop.permute.xlu1 %1310 }
 0x27d   : > { %1151 = vrot.lane.b32.xlu0 %v1101_v43, %s2792_s22  ;;  %v2603_v44 = vmul.bf16 %v2564_v15, %v1101_v43  ;;  %v1148_v47 = vld [vmem:[#allocation2 + $0x8] sm:$0xf]  ;;  %v1191_v58 = vmul.bf16 %v1188_v55, %v1101_v43  ;;  %v1272_v60 = vpop.permute.xlu0 %1271  ;;  %v1215_v34 = vmul.bf16 %v1212_v59, %v1101_v43  ;;  %v1254_v4 = vmul.bf16 %v1251_v45, %v1101_v43 }
 0x27e   : > { %1153 = vrot.lane.b32.xlu1 %v1148_v47, %s2792_s22  ;;  %v1231_v54 = vld [vmem:[#allocation2 + $0x8] sm:$0xf]  ;;  %v1273_v63 = vrot.slane %v1272_v60, 4  ;;  %v1312_v5 = vrot.slane %v1311_v0, 4  ;;  %s2017_s22 = sshll.u32 %s2314_s13, 7  ;;  %s2242_s13 = smov [#allocation6]  }
 0x27f   : > { %1146 = vst [vmem:[#allocation4] sm:$0xff] %v2603_v44  ;;  %v1294_v31 = vld [vmem:[#allocation2 + $0x8] sm:$0xf] }
 0x280   : > { %v1164_v33 = vld [vmem:[#allocation2 + $0x8] sm:$0xf]  ;;  %v1275_v6 = vsel %vm1274_vm9, %v1273_v63, %v1272_v60  ;;  %v1314_v8 = vsel %vm1313_vm10, %v1312_v5, %v1311_v0 }
 0x281   : > { %1234 = vrot.lane.b32.xlu0 %v1101_v43, %s2233_s29  ;;  %v1192_v61 = vmul.bf16 %v1186_v48, %v1164_v33  ;;  %v1207_v62 = vld [vmem:[#allocation2 + $0x8] sm:$0xf]  ;;  %v1278_v7 = vmul.bf16 %v1275_v6, %v1101_v43  ;;  %v1317_v12 = vmul.bf16 %v1314_v8, %v1101_v43 }
 0x282   : > { %1236 = vrot.lane.b32.xlu1 %v1231_v54, %s2233_s29  ;;  %v1216_v1 = vmul.bf16 %v1210_v56, %v1207_v62  ;;  %v1246_v2 = vld [vmem:[#allocation2 + $0x8] sm:$0xf] }
 0x283   : > { %v1255_v17 = vmul.bf16 %v1249_v39, %v1246_v2  ;;  %v1270_v9 = vld [vmem:[#allocation2 + $0x8] sm:$0xf] }
 0x284   : > { %v1279_v52 = vmul.bf16 %v1273_v63, %v1270_v9  ;;  %v1309_v10 = vld [vmem:[#allocation2 + $0x8] sm:$0xf] }
 0x285   : > { %1297 = vrot.lane.b32.xlu0 %v1101_v43, %s2790_s14  ;;  %v1318_v13 = vmul.bf16 %v1312_v5, %v1309_v10 }
 0x286   : > { %1299 = vrot.lane.b32.xlu1 %v1294_v31, %s2790_s14 }
 0x289   : > { %1195 = vrot.lane.b32.xlu0 %v1191_v58, %s2786_s16 }
 0x28a   : > { %1197 = vrot.lane.b32.xlu1 %v1192_v61, %s2786_s16  ;;  %s2238_s16 = smov 96  }
 0x28d   : > { %1219 = vrot.lane.b32.xlu0 %v1215_v34, %s2788_s17 }
 0x28e   : > { %1221 = vrot.lane.b32.xlu1 %v1216_v1, %s2788_s17  ;;  %s2239_s17 = smov 94  }
 0x291   : > { %1258 = vrot.lane.b32.xlu0 %v1254_v4, %s2237_s21 }
 0x292   : > { %1260 = vrot.lane.b32.xlu1 %v1255_v17, %s2237_s21 }
 0x295   : > { %1282 = vrot.lane.b32.xlu0 %v1278_v7, %s2238_s16 }
 0x296   : > { %1284 = vrot.lane.b32.xlu1 %v1279_v52, %s2238_s16 }
 0x299   : > { %1321 = vrot.lane.b32.xlu0 %v1317_v12, %s2239_s17 }
 0x29a   : > { %1323 = vrot.lane.b32.xlu1 %v1318_v13, %s2239_s17 }
 0x29d   : > { %1442 = vperm.xlu0 %2137, %v1439_v14  }
 0x29e   : > { %1448 = vperm.xlu1 %2138, %v1439_v14  }
 0x2a1   : > { %2140 = vset.pattern.permute.xlu0 %v2240_v40  ;;  %v1332_v40 = vld [vmem:[%s2781_s5] sm:$0x3] }
 0x2a2   : > { %2139 = vset.pattern.permute.xlu1 %v2225_v51 }
 0x2ef   : > { %v1152_v16 = vpop.permute.xlu0 %1151 }
 0x2f0   : > { %v1154_v18 = vpop.permute.xlu1 %1153  ;;  %v1155_v19 = vrot.slane %v1152_v16, 4 }
 0x2f1   : > { %v1156_v20 = vrot.slane %v1154_v18, 4 }
 0x2f3   : > { %v1235_v22 = vpop.permute.xlu0 %1234  ;;  %v1158_v35 = vsel %vm1157_vm11, %v1155_v19, %v1156_v20 }
 0x2f4   : > { %v1160_v53 = vsel %vm1159_vm12, %v1152_v16, %v1158_v35  ;;  %v1237_v23 = vpop.permute.xlu1 %1236  ;;  %v1238_v24 = vrot.slane %v1235_v22, 4  ;;  %v2241_v16 = vmov 1983009808  }
 0x2f5   : > { %1162 = vst [vmem:[#allocation4 + $0x8] sm:$0xff] %v1160_v53  ;;  %v1239_v25 = vrot.slane %v1237_v23, 4  ;;  %v1980_v28 = vcombine.high %v2603_v44, %v1160_v53  ;;  %v1979_v29 = vcombine.low %v2603_v44, %v1160_v53  ;;  %v1461_v18 = vunpack.c.l.s4 %v2241_v16 }
 0x2f7   : > { %v1298_v26 = vpop.permute.xlu0 %1297  ;;  %v1240_v30 = vsel %vm1157_vm11, %v1238_v24, %v1239_v25  ;;  %1398 = vmatprep.subr.bf16.mxu1 %v1980_v28  ;;  %v1462_v19 = vunpack.c.0.s8 %v1461_v18 }
 0x2f8   : > { %v1242_v32 = vsel %vm1241_vm13, %v1235_v22, %v1240_v30  ;;  %v1300_v49 = vpop.permute.xlu1 %1299  ;;  %1399 = vmatpush1.bf16.msra.mxu1 %v1979_v29  ;;  %v1301_v3 = vrot.slane %v1298_v26, 4 }
 0x2f9   : > { %1244 = vst [vmem:[#allocation4 + $0x20] sm:$0xff] %v1242_v32  ;;  %v1302_v21 = vrot.slane %v1300_v49, 4  ;;  %v2654_v20 = vsub.s32 %v1462_v19, %v2382_v27 }
 0x2fb   : > { %v1196_v36 = vpop.permute.xlu0 %1195  ;;  %v1303_v37 = vsel %vm1157_vm11, %v1301_v3, %v1302_v21  ;;  %v1533_v22 = vrot.slane %v2558_v11, %v2654_v20 }
 0x2fc   : > { %v1305_v38 = vsel %vm1304_vm14, %v1298_v26, %v1303_v37  ;;  %v1198_v41 = vpop.permute.xlu1 %1197  ;;  %v1199_v42 = vrot.slane %v1196_v36, 4 }
 0x2fd   : > { %v1200_v43 = vrot.slane %v1198_v41, 4  ;;  %1534 = vrot.lane.b32.xlu0 %v1533_v22, %s2227_s25  ;;  %s2803_s25 = smov 95  }
 0x2ff   : > { %v1220_v44 = vpop.permute.xlu0 %1219  ;;  %v1201_v46 = vsel %vm1157_vm11, %v1199_v42, %v1200_v43 }
 0x300   : > { %v1203_v47 = vsel %vm2797_vm15, %v1196_v36, %v1201_v46  ;;  %v1222_v48 = vpop.permute.xlu1 %1221  ;;  %v1223_v50 = vrot.slane %v1220_v44, 4 }
 0x301   : > { %1205 = vst [vmem:[#allocation4 + $0x10] sm:$0xff] %v1203_v47  ;;  %v1224_v54 = vrot.slane %v1222_v48, 4  ;;  %1627 = vrot.lane.b32.xlu0 %v1533_v22, %s2228_s26  ;;  %s2804_s26 = smov 112  }
 0x303   : > { %v1259_v55 = vpop.permute.xlu0 %1258  ;;  %v1225_v56 = vsel %vm1157_vm11, %v1223_v50, %v1224_v54 }
 0x304   : > { %v1227_v57 = vsel %vm1226_vm0, %v1220_v44, %v1225_v56  ;;  %v1261_v58 = vpop.permute.xlu1 %1260  ;;  %v1262_v31 = vrot.slane %v1259_v55, 4 }
 0x305   : > { %1229 = vst [vmem:[#allocation4 + $0x18] sm:$0xff] %v1227_v57  ;;  %v1263_v33 = vrot.slane %v1261_v58, 4  ;;  %v1982_v59 = vcombine.high %v1203_v47, %v1227_v57  ;;  %v1981_v60 = vcombine.low %v1203_v47, %v1227_v57  ;;  %1720 = vrot.lane.b32.xlu0 %v1533_v22, %s2230_s23 }
 0x307   : > { %v1283_v39 = vpop.permute.xlu0 %1282  ;;  %v1264_v61 = vsel %vm1157_vm11, %v1262_v31, %v1263_v33  ;;  %1400 = vmatprep.subr.bf16.mxu1 %v1982_v59 }
 0x308   : > { %v1266_v62 = vsel %vm2796_vm1, %v1259_v55, %v1264_v61  ;;  %v1285_v34 = vpop.permute.xlu1 %1284  ;;  %1401 = vmatpush1.bf16.msra.mxu1 %v1981_v60  ;;  %v1286_v45 = vrot.slane %v1283_v39, 4  ;;  %vm1474_vm1 = vcmask 136196  }
 0x309   : > { %v1287_v63 = vrot.slane %v1285_v34, 4  ;;  %v1983_v0 = vcombine.low %v1242_v32, %v1266_v62  ;;  %v1984_v1 = vcombine.high %v1242_v32, %v1266_v62 }
 0x30b   : > { %v1322_v2 = vpop.permute.xlu0 %1321  ;;  %v1288_v4 = vsel %vm1157_vm11, %v1286_v45, %v1287_v63  ;;  %1402 = vmatprep.subr.bf16.mxu1 %v1984_v1 }
 0x30c   : > { %v1290_v5 = vsel %vm2794_vm3, %v1283_v39, %v1288_v4  ;;  %v1324_v6 = vpop.permute.xlu1 %1323  ;;  %1403 = vmatpush1.bf16.msra.mxu1 %v1983_v0  ;;  %v1325_v17 = vrot.slane %v1322_v2, 4  ;;  %vm1387_vm3 = vcmask 588800  }
 0x30d   : > { %v1326_v7 = vrot.slane %v1324_v6, 4  ;;  %v1985_v8 = vcombine.low %v1290_v5, %v1305_v38  ;;  %v1986_v9 = vcombine.high %v1290_v5, %v1305_v38 }
 0x30f   : > { %v1327_v52 = vsel %vm1157_vm11, %v1325_v17, %v1326_v7  ;;  %1404 = vmatprep.subr.bf16.mxu1 %v1986_v9 }
 0x310   : > { %v1329_v10 = vsel %vm2795_vm5, %v1322_v2, %v1327_v52  ;;  %1405 = vmatpush1.bf16.msra.mxu1 %v1985_v8  ;;  %vm358_vm5 = vcmask 271496  }
 0x311   : > { %v1988_v12 = vcombine.high %v1329_v10, %v1329_v10  ;;  %v1987_v13 = vcombine.low %v1329_v10, %v1329_v10  ;;  %359 = vst.msk [vmem:[#allocation3 + $0x4] sm:$0x3] %vm358_vm5, %v2225_v51  ;;  %v1485_v51 = vrot.slane %v2564_v15, %v2654_v20 }
 0x313   : > { %1989 = vmatprep.subr.msk.bf16.mxu1 %vm1157_vm11, %v1988_v12  ;;  %v1393_v14 = vsel %vm1157_vm11, %v1987_v13, 0 }
 0x314   : > { %1407 = vmatpush1.bf16.msra.mxu1 %v1393_v14 }
 0x317   : > { %1990 = vmatmul.mubr.msk.bf16.vlgmr.msra.gmra.mrb[4].mxu1 %vm1387_vm3, %v1332_v40  ;;  %vm1472_vm3 = vcmask 1043458  }
 0x318   : > { %vm1473_vm5 = vmor %vm1472_vm3, %vm378_vm2  ;;  %vm2806_vm2 = vcmask 1031168  }
 0x319   : > { %vm1475_vm15 = vmor %vm1474_vm1, %vm1473_vm5 }
 0x31c   : > { %v1443_v35 = vpop.permute.xlu0 %1442 }
 0x31d   : > { %v1449_v23 = vpop.permute.xlu1 %1448 }
 0x36f   : > { %v1535_v41 = vpop.permute.xlu0 %1534 }
 0x370   : > { %v1536_v43 = vrot.slane %v1535_v41, 6 }
 0x372   : > { %v1537_v57 = vsel %vm1187_vm6, %v1536_v43, %v1535_v41  ;;  %vm2808_vm6 = vcmask 785408  }
 0x373   : > { %v1628_v39 = vpop.permute.xlu0 %1627 }
 0x374   : > { %v1629_v45 = vrot.slane %v1628_v39, 6 }
 0x376   : > { %v1630_v7 = vsel %vm1250_vm8, %v1629_v45, %v1628_v39  ;;  %vm1787_vm8 = vcmask 1041408  }
 0x377   : > { %v1721_v2 = vpop.permute.xlu0 %1720 }
 0x378   : > { %v1722_v8 = vrot.slane %v1721_v2, 6 }
 0x37a   : > { %v1723_v13 = vsel %vm1313_vm10, %v1722_v8, %v1721_v2 }
 0x3ea   : > { %v1432_v53 = vpop.f32.mrb[4].mxu1 }
 0x3eb   : > { %v1445_v24 = vmul.f32 %v1443_v35, %v1432_v53  ;;  %v1434_v25 = vpop.f32.mrb[5].mxu1 }
 0x3ec   : > { %v1446_v26 = vmul.f32 %v1443_v35, %v1434_v25  ;;  %v1436_v27 = vpop.f32.mrb[6].mxu1 }
 0x3ed   : > { %v1451_v28 = vadd.f32 %v1449_v23, %v1445_v24  ;;  %v1437_v29 = vpop.f32.mrb[7].mxu1 }
 0x3ee   : > { %v1452_v30 = vadd.f32 %v1449_v23, %v1446_v26 }
 0x3ef   : > { %v1453_v11 = vmax.f32 %v1451_v28, 0.0 }
 0x3f0   : > { %v1454_v32 = vmax.f32 %v1452_v30, 0.0  ;;  %v1835_v30 = vld [vmem:[%s2784_s8] sm:$0xf] }
 0x3f2   : > { %v1991_v49 = vpack.c.bf16 %v1454_v32, %v1453_v11 }
 0x3f4   : > { %v1466_v3 = vrot.slane %v1991_v49, %v2654_v20 }
 0x3f6   : > { %1467 = vrot.lane.b32.xlu1 %v1466_v3, %s2219_s24  ;;  %s2802_s24 = smov 127  }
 0x3fa   : > { %1567 = vrot.lane.b32.xlu1 %v1485_v51, %s2229_s27  ;;  %s2805_s27 = smov 126  }
 0x3fe   : > { %1660 = vrot.lane.b32.xlu1 %v1485_v51, %s2231_s28 }
 0x468   : > { %v1468_v21 = vpop.permute.xlu1 %1467 }
 0x469   : > { %v1469_v36 = vrot.slane %v1468_v21, 6 }
 0x46b   : > { %v1470_v37 = vsel %vm374_vm4, %v1469_v36, %v1468_v21  ;;  %vm2807_vm4 = vcmask 900096  }
 0x46c   : > { %1476 = vst.msk [vmem:[#allocation3] sm:$0x3f] %vm1475_vm15, %v1470_v37  ;;  %v1568_v38 = vpop.permute.xlu1 %1567 }
 0x46d   : > { %v1569_v44 = vrot.slane %v1568_v38, 6 }
 0x46f   : > { %v1570_v31 = vsel %vm1211_vm7, %v1569_v44, %v1568_v38  ;;  %vm2809_vm7 = vcmask 769024  }
 0x470   : > { %v1661_v15 = vpop.permute.xlu1 %1660 }
 0x471   : > { %v1662_v50 = vrot.slane %v1661_v15, 6 }
 0x473   : > { %v1477_v42 = vld [vmem:[#allocation3] sm:$0xf]  ;;  %v1663_v0 = vsel %vm1274_vm9, %v1662_v50, %v1661_v15  ;;  %vm1783_vm9 = vcmask 293888  }
 0x474   : > { %v1487_v46 = vmul.bf16 %v1485_v51, %v1477_v42  ;;  %v1599_v47 = vld [vmem:[#allocation3] sm:$0x3f] }
 0x475   : > { %v1498_v48 = vld [vmem:[#allocation3] sm:$0x3f]  ;;  %v1608_v54 = vrot.slane %v1599_v47, %v2654_v20  ;;  %v1601_v6 = vcombine.high %v1599_v47, %v1599_v47 }
 0x476   : > { %1992 = vst.sshfl [vmem:[#allocation4] sm:$0xf pattern:$0x76325410] %v1487_v46  ;;  %v1514_v55 = vrot.slane %v1498_v48, %v2654_v20  ;;  %v1525_v56 = vld [vmem:[#allocation3] sm:$0x3f]  ;;  %v1500_v59 = vcombine.low %v1498_v48, %v1498_v48 }
 0x477   : > { %v1566_v58 = vld [vmem:[#allocation3] sm:$0x3f]  ;;  %1616 = vrot.lane.b32.xlu1 %v1608_v54, %s2233_s29  ;;  %v1539_v60 = vmul.bf16 %v1537_v57, %v1525_v56  ;;  %v1615_v52 = vrot.slane %v1601_v6, %v2654_v20 }
 0x478   : > { %v1692_v33 = vld [vmem:[#allocation3] sm:$0x3f]  ;;  %1517 = vrot.lane.b32.xlu0 %v1514_v55, %s2802_s24  ;;  %v1572_v61 = vmul.bf16 %v1570_v31, %v1566_v58  ;;  %v1507_v34 = vrot.slane %v1500_v59, %v2654_v20 }
 0x479   : > { %v1708_v62 = vrot.slane %v1692_v33, %v2654_v20  ;;  %v1659_v63 = vld [vmem:[#allocation3] sm:$0x3f]  ;;  %v1548_v5 = vrot.slane %v1539_v60, %v2654_v20  ;;  %v1694_v12 = vcombine.low %v1692_v33, %v1692_v33  ;;  %v1541_v14 = vcombine.high %v1539_v60, %v1539_v60 }
 0x47a   : > { %v1665_v1 = vmul.bf16 %v1663_v0, %v1659_v63  ;;  %v1588_v4 = vrot.slane %v1572_v61, %v2654_v20  ;;  %v1626_v17 = vld [vmem:[#allocation3] sm:$0x3f]  ;;  %v1574_v40 = vcombine.low %v1572_v61, %v1572_v61 }
 0x47b   : > { %1515 = vrot.lane.b32.xlu1 %v1507_v34, %s2802_s24  ;;  %v1632_v9 = vmul.bf16 %v1630_v7, %v1626_v17  ;;  %v1719_v16 = vld [vmem:[#allocation3] sm:$0x3f]  ;;  %v1701_v18 = vrot.slane %v1694_v12, %v2654_v20  ;;  %v1555_v24 = vrot.slane %v1541_v14, %v2654_v20 }
 0x47c   : > { %1711 = vrot.lane.b32.xlu0 %v1708_v62, %s2803_s25  ;;  %v1674_v10 = vrot.slane %v1665_v1, %v2654_v20  ;;  %v1725_v22 = vmul.bf16 %v1723_v13, %v1719_v16  ;;  %v1667_v53 = vcombine.high %v1665_v1, %v1665_v1  ;;  %v1581_v23 = vrot.slane %v1574_v40, %v2654_v20 }
 0x47d   : > { %v1648_v19 = vrot.slane %v1632_v9, %v2654_v20  ;;  %v1634_v35 = vcombine.low %v1632_v9, %v1632_v9 }
 0x47e   : > { %v1727_v25 = vcombine.high %v1725_v22, %v1725_v22  ;;  %v1681_v26 = vrot.slane %v1667_v53, %v2654_v20  ;;  %v1734_v28 = vrot.slane %v1725_v22, %v2654_v20 }
 0x47f   : > { %1556 = vrot.lane.b32.xlu1 %v1548_v5, %s2805_s27  ;;  %v1641_v27 = vrot.slane %v1634_v35, %v2654_v20 }
 0x480   : > { %1591 = vrot.lane.b32.xlu0 %v1588_v4, %s2804_s26  ;;  %v1741_v29 = vrot.slane %v1727_v25, %v2654_v20 }
 0x483   : > { %1682 = vrot.lane.b32.xlu1 %v1674_v10, %s2238_s16 }
 0x484   : > { %1618 = vrot.lane.b32.xlu0 %v1615_v52, %s2233_s29  ;;  %s2157_s29 = sshll.u32 %s2242_s13, 4  ;;  %s2158_s29 = int_to_ptr.vmem [resolvable:$false] %s2157_s29 }
 0x487   : > { %1709 = vrot.lane.b32.xlu1 %v1701_v18, %s2803_s25 }
 0x488   : > { %1651 = vrot.lane.b32.xlu0 %v1648_v19, %s2237_s21 }
 0x48b   : > { %1589 = vrot.lane.b32.xlu1 %v1581_v23, %s2804_s26  ;;  %v1752_v23 = vld [vmem:[%s2782_s6] sm:$0x3] }
 0x48c   : > { %1558 = vrot.lane.b32.xlu0 %v1555_v24, %s2805_s27  ;;  %s2734_s27 = scalar_lea.hbm %s2785_s9, %s2017_s22 }
 0x48f   : > { %1649 = vrot.lane.b32.xlu1 %v1641_v27, %s2237_s21 }
 0x490   : > { %1684 = vrot.lane.b32.xlu0 %v1681_v26, %s2238_s16  ;;  %s2159_s16 = scalar_lea.vmem %s2158_s29, 256 }
 0x493   : > { %1742 = vrot.lane.b32.xlu1 %v1734_v28, %s2239_s17 }
 0x494   : > { %1744 = vrot.lane.b32.xlu0 %v1741_v29, %s2239_s17  ;;  %s338_s17 = sand.u32 1, %s2207_s10  }
 0x495   : > { %s1946_s21 = sshll.u32 %s338_s17, 3  ;;  %s1857_s23 = scalar_lea.sflag [#allocation7], %s338_s17 }
 0x496   : > { %s340_s14 = scalar_lea.vmem [#allocation6], %s1946_s21 }
 0x497   : > { %1838 = vperm.xlu1 %2139, %v1835_v30   ;;  %s1871_s24 = sshll.u32 %s340_s14, 4  ;;  %s2736_s24 = int_to_ptr.vmem [resolvable:$true] %s1871_s24 }
 0x498   : > { %1844 = vperm.xlu0 %2140, %v1835_v30   ;;  %s2153_s28 = scalar_lea.vmem %s2736_s24, 128  ;;  %p2160_p0 = scmp.lt.s32.totalorder %s2736_s24, %s2158_s29 }
 0x499   : > { %p2154_p11 = scmp.ne.s32.totalorder %s2736_s24, %s2153_s28  ;;  %p2161_p1 = scmp.lt.s32.totalorder %s2159_s16, %s2153_s28 }
 0x49b   : > { %p2155_p12 = pnand %p2154_p11, %p2331_p5  ;;  %p2162_p2 = por %p2161_p1, %p2160_p0 }
 0x49d   : > { %p2156_p13 = pneg %p2155_p12 }
 0x49f   : > { %p2163_p3 = pnand %p2162_p2, %p2156_p13 }
 0x4e9   : > { %v1617_v11 = vpop.permute.xlu1 %1616 }
 0x4ea   : > { %v1518_v32 = vpop.permute.xlu0 %1517  ;;  %v1620_v43 = vrot.slane %v1617_v11, 4 }
 0x4eb   : > { %v1520_v51 = vrot.slane %v1518_v32, 4 }
 0x4ed   : > { %v1516_v49 = vpop.permute.xlu1 %1515 }
 0x4ee   : > { %v1712_v3 = vpop.permute.xlu0 %1711  ;;  %v1519_v21 = vrot.slane %v1516_v49, 4 }
 0x4ef   : > { %v1714_v50 = vrot.slane %v1712_v3, 4 }
 0x4f0   : > { %v1521_v36 = vsel %vm1157_vm11, %v1519_v21, %v1520_v51 }
 0x4f1   : > { %v1522_v20 = vsel %vm1159_vm12, %v1516_v49, %v1521_v36  ;;  %v1557_v37 = vpop.permute.xlu1 %1556 }
 0x4f2   : > { %v1592_v38 = vpop.permute.xlu0 %1591  ;;  %1524 = vst [vmem:[#allocation4] sm:$0xcc] %v1522_v20  ;;  %v1560_v31 = vrot.slane %v1557_v37, 4 }
 0x4f3   : > { %v1594_v33 = vrot.slane %v1592_v38, 4 }
 0x4f5   : > { %v1683_v41 = vpop.permute.xlu1 %1682 }
 0x4f6   : > { %v1619_v42 = vpop.permute.xlu0 %1618  ;;  %v1686_v0 = vrot.slane %v1683_v41, 4 }
 0x4f7   : > { %v1621_v44 = vrot.slane %v1619_v42, 4 }
 0x4f9   : > { %v1622_v15 = vsel %vm1157_vm11, %v1620_v43, %v1621_v44  ;;  %v1710_v47 = vpop.permute.xlu1 %1709 }
 0x4fa   : > { %v1623_v46 = vsel %vm1241_vm13, %v1617_v11, %v1622_v15  ;;  %v1652_v48 = vpop.permute.xlu0 %1651  ;;  %v1713_v54 = vrot.slane %v1710_v47, 4 }
 0x4fb   : > { %1625 = vst [vmem:[#allocation4 + $0x10] sm:$0x33] %v1623_v46  ;;  %v1654_v1 = vrot.slane %v1652_v48, 4 }
 0x4fc   : > { %v1715_v55 = vsel %vm1157_vm11, %v1713_v54, %v1714_v50 }
 0x4fd   : > { %v1716_v56 = vsel %vm1304_vm14, %v1710_v47, %v1715_v55  ;;  %v1590_v57 = vpop.permute.xlu1 %1589 }
 0x4fe   : > { %v1559_v58 = vpop.permute.xlu0 %1558  ;;  %1718 = vst [vmem:[#allocation4 + $0x18] sm:$0xcc] %v1716_v56  ;;  %v1593_v39 = vrot.slane %v1590_v57, 4 }
 0x4ff   : > { %v1561_v59 = vrot.slane %v1559_v58, 4 }
 0x500   : > { %v1595_v60 = vsel %vm1157_vm11, %v1593_v39, %v1594_v33 }
 0x501   : > { %v1562_v61 = vsel %vm1157_vm11, %v1560_v31, %v1561_v59  ;;  %v1596_v62 = vsel %vm1226_vm0, %v1590_v57, %v1595_v60  ;;  %v1650_v45 = vpop.permute.xlu1 %1649 }
 0x502   : > { %v1563_v34 = vsel %vm2806_vm2, %v1557_v37, %v1562_v61  ;;  %v1685_v63 = vpop.permute.xlu0 %1684  ;;  %1598 = vst [vmem:[#allocation4 + $0x8] sm:$0xcc] %v1596_v62  ;;  %v1653_v2 = vrot.slane %v1650_v45, 4 }
 0x503   : > { %1565 = vst [vmem:[#allocation4 + $0x8] sm:$0x33] %v1563_v34  ;;  %v1687_v4 = vrot.slane %v1685_v63, 4 }
 0x504   : > { %v1655_v5 = vsel %vm1157_vm11, %v1653_v2, %v1654_v1 }
 0x505   : > { %v1688_v6 = vsel %vm1157_vm11, %v1686_v0, %v1687_v4  ;;  %v1656_v17 = vsel %vm2807_vm4, %v1650_v45, %v1655_v5  ;;  %v1743_v8 = vpop.permute.xlu1 %1742 }
 0x506   : > { %v1689_v7 = vsel %vm2808_vm6, %v1683_v41, %v1688_v6  ;;  %v1745_v9 = vpop.permute.xlu0 %1744  ;;  %1658 = vst [vmem:[#allocation4 + $0x10] sm:$0xcc] %v1656_v17  ;;  %v1746_v52 = vrot.slane %v1743_v8, 4 }
 0x507   : > { %1691 = vst [vmem:[#allocation4 + $0x18] sm:$0x33] %v1689_v7  ;;  %v1747_v10 = vrot.slane %v1745_v9, 4 }
 0x509   : > { %v1748_v12 = vsel %vm1157_vm11, %v1746_v52, %v1747_v10 }
 0x50a   : > { %v1749_v13 = vsel %vm2809_vm7, %v1743_v8, %v1748_v12  ;;  %v2145_v14 = vld [vmem:[#allocation4] ss:$8 sps:$4 sm:$0xff]   ;;  %v2147_v40 = vld [vmem:[#allocation4 + $0x4] ss:$8 sps:$4 sm:$0xff]  }
 0x50b   : > { %1751 = vst [vmem:[#allocation4 + $0x20] sm:$0x33] %v1749_v13  ;;  %1794 = vmatprep.subr.bf16.mxu0 %v2147_v40 }
 0x50c   : > { %1795 = vmatpush1.bf16.msra.mxu0 %v2145_v14 }
 0x50e   : > { %v2148_v16 = vld [vmem:[#allocation4 + $0x10] ss:$8 sps:$4 sm:$0xff]   ;;  %v2150_v18 = vld [vmem:[#allocation4 + $0x14] ss:$8 sps:$4 sm:$0xff]  }
 0x50f   : > { %1796 = vmatprep.subr.bf16.mxu0 %v2150_v18 }
 0x510   : > { %1797 = vmatpush1.bf16.msra.mxu0 %v2148_v16 }
 0x512   : > { %v1757_v19 = vld [vmem:[#allocation4 + $0x20] sm:$0x33] }
 0x513   : > { %v1998_v22 = vcombine.high %v1757_v19, %v1757_v19  ;;  %v1997_v35 = vcombine.low %v1757_v19, %v1757_v19 }
 0x515   : > { %1999 = vmatprep.subr.msk.bf16.mxu0 %vm1787_vm8, %v1998_v22  ;;  %v1789_v53 = vsel %vm1787_vm8, %v1997_v35, 0 }
 0x516   : > { %1799 = vmatpush1.bf16.msra.mxu0 %v1789_v53  ;;  %v1839_v24 = vpop.permute.xlu1 %1838 }
 0x517   : > { %v1845_v26 = vpop.permute.xlu0 %1844 }
 0x519   : > { %2000 = vmatmul.mubr.msk.bf16.vlgmr.msra.gmra.mrb[12].mxu0 %vm1783_vm9, %v1752_v23 }
 0x5ec   : > { %v1828_v25 = vpop.f32.mrb[12].mxu0 }
 0x5ed   : > { %v1830_v27 = vpop.f32.mrb[13].mxu0  ;;  %v1841_v28 = vmul.f32 %v1839_v24, %v1828_v25 }
 0x5ee   : > { %v1832_v29 = vpop.f32.mrb[14].mxu0  ;;  %v1842_v30 = vmul.f32 %v1839_v24, %v1830_v27 }
 0x5ef   : > { %v1833_v11 = vpop.f32.mrb[15].mxu0  ;;  %v1847_v32 = vadd.f32 %v1845_v26, %v1841_v28 }
 0x5f0   : > { %v1848_v49 = vadd.f32 %v1845_v26, %v1842_v30 }
 0x5f1   : > { %v1849_v3 = vmax.f32 %v1847_v32, 0.0 }
 0x5f2   : > { %v1850_v51 = vmax.f32 %v1848_v49, 0.0 }
 0x5f4   : > { %v1853_v21 = vcombine.low %v1849_v3, %v1850_v51 }
 0x5f6   : > { %1855 = vst [vmem:[%s340_s14] sm:$0xff] %v1853_v21 }
 0x5f7   : > { %2166 = shalt.err (!%p2163_p3)
}
 0x5f8   : > { %s2167_s17 = scalar_lea.hbm %s2734_s27, 128  ;;  %s2171_s14 = scalar_lea.hbm %s2785_s9, 256 }
 0x5f9   : > { %p2168_p4 = scmp.ne.s32.totalorder %s2734_s27, %s2167_s17  ;;  %p2172_p9 = scmp.lt.u32.totalorder %s2734_s27, %s2785_s9 }
 0x5fa   : > { %p2173_p10 = scmp.lt.u32.totalorder %s2171_s14, %s2167_s17  ;;  %p2175_p12 = scmp.lt.u32.totalorder %s2167_s17, %s2734_s27 }
 0x5fb   : > { %p2169_p7 = pnand %p2168_p4, %p2331_p5 }
 0x5fc   : > { %p2174_p11 = por %p2173_p10, %p2172_p9 }
 0x5fd   : > { %p2170_p8 = pneg %p2169_p7 }
 0x5fe   : > { %p2176_p13 = por %p2175_p12, %p2174_p11 }
 0x600   : > { %p2177_p0 = pnand %p2176_p13, %p2170_p8 }
 0x602   : > { %2180 = shalt.err (!%p2177_p0)
}
 0x603   : > { %2073 = dma.vmem_to_hbm [thread:$0]  (%p2331_p5), %s2736_s24, 128, %s2734_s27, %s1857_s23  }
 0x604 PF: > { %p2079_p1 = scmp.ge.s32.totalorder %s2215_s12, 2  ;;  %s1883_s28 = sand.u32 1, %s2203_s30  }
 0x605   : > { %s1884_s13 = scalar_lea.sflag [#allocation7], %s1883_s28 }
 0x606   : > { %p2076_p2 = pnand %p2079_p1, %p2335_p6 }
 0x608   : > { %2198 = dma.done.wait (!%p2076_p2), %s1884_s13, 128  }
 0x609   : > { %2200 = vsyncadd (!%p2076_p2), %s1884_s13, 4294967168  ;;  %p19_p3 = scmp.ge.s32.totalorder %s2318_s15, 4   ;;  %s2810_s30 = smov %s2207_s10 }
 0x60a   : > { %s2811_s10 = smov %s2211_s11  ;;  %s2812_s11 = smov %s2329_s18 }
 0x60b   : > { %s2813_s12 = smov %s2318_s15  ;;  %21 = sbr.rel (!%p19_p3) target bundleno = 3 (0x3), region = 94 }
 0x612   :  { %1889 = vsyncpa [#allocation7], 1 }
 0x613   :  { %1891 = vsyncpa [#allocation7 + $0x1], 1 }

</bundles_post_ra>
